<compile_context>
chip_gen: v5e
topology: v5e:2x2
jax: 0.10.0
libtpu: 0.0.40
codegen_flags: <defaults>
</compile_context>

<pallas_src>
import functools

import jax
import jax.numpy as jnp
from jax.experimental import pallas as pl
from jax.experimental.pallas import tpu as pltpu

# Matmul-operand dtype (MXU); accumulation stays f32 via preferred_element_type.
_MXU_DTYPE = jnp.bfloat16


# ----------------------------- in-kernel helpers ---------------------------- #

def _ln(x, g, b, eps):
    mu = jnp.mean(x, axis=-1, keepdims=True)
    var = jnp.mean(jnp.square(x - mu), axis=-1, keepdims=True)
    return (x - mu) * jax.lax.rsqrt(var + eps) * g + b


def _encoder_layer(x, wqkv, bqkv, wo3, bo, ln1g, ln1b, w1, b1, w2, b2, ln2g, ln2b,
                   *, B, S, nH, D, eps):
    """One BERT encoder layer on an (M, H) f32 slab; everything VMEM-resident."""
    H = nH * D

    # Fused QKV projection (single (H, 3H) MXU push); the 1/sqrt(D) softmax scale is
    # already folded into the Q weight/bias columns at weight-prep time.
    qkv = jnp.dot(x.astype(_MXU_DTYPE), wqkv,
                  preferred_element_type=jnp.float32) + bqkv            # (M, 3H) f32

    attn_rows = []
    # TODO(synk): for large batches lift B onto a ("parallel") grid axis instead of
    # this static Python loop (B=2 here).
    for b in range(B):
        qkv_b = qkv[b * S:(b + 1) * S, :]                               # (S, 3H)
        # Head split -> leading batch dim (nH, S, D); all heads handled by ONE batched
        # einsum each below (no per-head unrolled attention code).
        q = jnp.stack([qkv_b[:, h * D:(h + 1) * D]
                       for h in range(nH)], axis=0).astype(_MXU_DTYPE)
        k = jnp.stack([qkv_b[:, H + h * D:H + (h + 1) * D]
                       for h in range(nH)], axis=0).astype(_MXU_DTYPE)
        v = jnp.stack([qkv_b[:, 2 * H + h * D:2 * H + (h + 1) * D]
                       for h in range(nH)], axis=0).astype(_MXU_DTYPE)

        s = jnp.einsum("hqd,hkd->hqk", q, k,
                       preferred_element_type=jnp.float32)              # (nH, S, S)
        s = s - jnp.max(s, axis=-1, keepdims=True)
        p = jnp.exp(s)                                                  # f32 (EUP)
        p = p / jnp.sum(p, axis=-1, keepdims=True)      # exact softmax normalization
        ctx = jnp.einsum("hqk,hkd->hqd", p.astype(_MXU_DTYPE), v,
                         preferred_element_type=jnp.float32)            # (nH, S, D)

        # Head merge folded into the output projection: batched per-head (S,D)x(D,H)
        # matmul then a cheap sum over the leading head axis (no lane concatenate).
        proj = jnp.einsum("hqd,hdo->hqo", ctx.astype(_MXU_DTYPE), wo3,
                          preferred_element_type=jnp.float32)           # (nH, S, H)
        attn_rows.append(jnp.sum(proj, axis=0))                         # (S, H)

    attn = jnp.concatenate(attn_rows, axis=0) + bo                      # (M, H)
    h1 = _ln(x + attn, ln1g, ln1b, eps)

    inter = jnp.dot(h1.astype(_MXU_DTYPE), w1,
                    preferred_element_type=jnp.float32) + b1            # (M, I)
    # TODO(synk): HF BERT uses exact (erf) GELU; tanh approximation keeps the EUP path.
    inter = jax.nn.gelu(inter, approximate=True)
    ffn = jnp.dot(inter.astype(_MXU_DTYPE), w2,
                  preferred_element_type=jnp.float32) + b2
    return _ln(h1 + ffn, ln2g, ln2b, eps)


# -------------------------- fully fused forward kernel ---------------------- #

def _forward_body(x_ref, emb_g_ref, emb_b_ref,
                  wqkv_ref, bqkv_ref, wo3_ref, bo_ref, ln1g_ref, ln1b_ref,
                  w1_ref, b1_ref, w2_ref, b2_ref, ln2g_ref, ln2b_ref,
                  pw_ref, pb_ref, cw_ref, cb_ref,
                  logits_ref, loss_ref, labels_ref, h_ref,
                  *, B, S, nH, D, eps):
    layer = pl.program_id(0)
    n_layers = pl.num_programs(0)

    # ---- step 0: embedding LayerNorm seeds the VMEM-resident hidden state -------- #
    @pl.when(layer == 0)
    def _():
        h_ref[...] = _ln(x_ref[...], emb_g_ref[...], emb_b_ref[...], eps)

    # ---- one encoder layer (this grid step's weight blocks) ---------------------- #
    new_h = _encoder_layer(
        h_ref[...], wqkv_ref[...], bqkv_ref[...], wo3_ref[...], bo_ref[...],
        ln1g_ref[...], ln1b_ref[...], w1_ref[...], b1_ref[...],
        w2_ref[...], b2_ref[...], ln2g_ref[...], ln2b_ref[...],
        B=B, S=S, nH=nH, D=D, eps=eps)
    h_ref[...] = new_h

    # ---- last step: pooler + classifier (+ cross-entropy) epilogue --------------- #
    @pl.when(layer == n_layers - 1)
    def _():
        # [CLS] rows (row b*S of the (M, H) slab for each batch element).
        cls_rows = jnp.concatenate([new_h[b * S:b * S + 1, :] for b in range(B)],
                                   axis=0)                                # (B, H)
        pooled = jnp.tanh(jnp.dot(cls_rows.astype(_MXU_DTYPE), pw_ref[...],
                                  preferred_element_type=jnp.float32) + pb_ref[...])
        logits = jnp.dot(pooled.astype(_MXU_DTYPE), cw_ref[...],
                         preferred_element_type=jnp.float32) + cb_ref[...]  # (B, C)
        logits_ref[...] = logits

        if labels_ref is not None:
            C = logits.shape[1]
            ids = jax.lax.broadcasted_iota(jnp.int32, (1, C), 1)   # hoisted out of loop
            total = jnp.zeros((1, 1), jnp.float32)
            count = jnp.zeros((1, 1), jnp.float32)
            for b in range(B):
                row = logits[b:b + 1, :]                                  # (1, C)
                lab = labels_ref[b]                                       # SMEM scalar
                m = jnp.max(row, axis=-1, keepdims=True)
                lse = jnp.log(jnp.sum(jnp.exp(row - m), axis=-1, keepdims=True)) + m
                picked = jnp.sum(jnp.where(ids == lab, row, 0.0),
                                 axis=-1, keepdims=True)
                valid = (lab != -100).astype(jnp.float32)   # torch ignore_index=-100
                total = total + (lse - picked) * valid
                count = count + valid
            # NOTE: if every label is -100 this is 0/0 (NaN), matching torch.
            loss_ref[...] = total / count


def _fused_kernel_loss(labels_ref, x_ref, emb_g_ref, emb_b_ref,
                       wqkv_ref, bqkv_ref, wo3_ref, bo_ref, ln1g_ref, ln1b_ref,
                       w1_ref, b1_ref, w2_ref, b2_ref, ln2g_ref, ln2b_ref,
                       pw_ref, pb_ref, cw_ref, cb_ref,
                       logits_ref, loss_ref, h_ref, *, B, S, nH, D, eps):
    _forward_body(x_ref, emb_g_ref, emb_b_ref, wqkv_ref, bqkv_ref, wo3_ref, bo_ref,
                  ln1g_ref, ln1b_ref, w1_ref, b1_ref, w2_ref, b2_ref,
                  ln2g_ref, ln2b_ref, pw_ref, pb_ref, cw_ref, cb_ref,
                  logits_ref, loss_ref, labels_ref, h_ref,
                  B=B, S=S, nH=nH, D=D, eps=eps)


def _fused_kernel_nolabels(x_ref, emb_g_ref, emb_b_ref,
                           wqkv_ref, bqkv_ref, wo3_ref, bo_ref, ln1g_ref, ln1b_ref,
                           w1_ref, b1_ref, w2_ref, b2_ref, ln2g_ref, ln2b_ref,
                           pw_ref, pb_ref, cw_ref, cb_ref,
                           logits_ref, h_ref, *, B, S, nH, D, eps):
    _forward_body(x_ref, emb_g_ref, emb_b_ref, wqkv_ref, bqkv_ref, wo3_ref, bo_ref,
                  ln1g_ref, ln1b_ref, w1_ref, b1_ref, w2_ref, b2_ref,
                  ln2g_ref, ln2b_ref, pw_ref, pb_ref, cw_ref, cb_ref,
                  logits_ref, None, None, h_ref,
                  B=B, S=S, nH=nH, D=D, eps=eps)


def bert_re_fused(x2d, p, labels, *, B, S, nH, eps, num_labels):
    """Single pallas_call running: embed LN -> all encoder layers -> pooler ->
    classifier (-> cross-entropy).  grid=(num_layers,) streams the stacked
    per-layer weights; the hidden state stays resident in VMEM scratch."""
    M, H = x2d.shape
    D = H // nH
    L = p["wqkv"].shape[0]
    I = p["w1"].shape[-1]
    C = num_labels

    def res(*shape):          # whole-array resident block (same block every step)
        return pl.BlockSpec(shape, lambda l, *_: (0,) * len(shape))

    def per_layer(*shape):    # stacked layer weight: leading L axis squeezed away
        return pl.BlockSpec((None,) + shape, lambda l, *_: (l,) + (0,) * len(shape))

    in_specs = [
        res(M, H),                                    # summed embeddings
        res(1, H), res(1, H),                         # embedding LayerNorm g, b
        per_layer(H, 3 * H), per_layer(1, 3 * H),     # fused QKV proj (Q pre-scaled)
        per_layer(nH, D, H), per_layer(1, H),         # per-head out proj + bias
        per_layer(1, H), per_layer(1, H),             # attn LayerNorm g, b
        per_layer(H, I), per_layer(1, I),             # FFN in
        per_layer(I, H), per_layer(1, H),             # FFN out
        per_layer(1, H), per_layer(1, H),             # out LayerNorm g, b
        res(H, H), res(1, H),                         # pooler
        res(H, C), res(1, C),                         # classifier
    ]
    operands = (x2d, p["emb_ln_g"], p["emb_ln_b"],
                p["wqkv"], p["bqkv"], p["wo3"], p["bo"], p["ln1_g"], p["ln1_b"],
                p["w1"], p["b1"], p["w2"], p["b2"], p["ln2_g"], p["ln2_b"],
                p["pool_w"], p["pool_b"], p["cls_w"], p["cls_b"])
    scratch = [pltpu.VMEM((M, H), jnp.float32)]       # hidden state, persists across layers
    cparams = pltpu.CompilerParams(dimension_semantics=("arbitrary",))

    if labels is None:
        kern = functools.partial(_fused_kernel_nolabels, B=B, S=S, nH=nH, D=D, eps=eps)
        logits = pl.pallas_call(
            kern,
            out_shape=jax.ShapeDtypeStruct((B, C), jnp.float32),
            grid_spec=pltpu.PrefetchScalarGridSpec(
                num_scalar_prefetch=0, grid=(L,),
                in_specs=in_specs,
                out_specs=pl.BlockSpec((B, C), lambda l, *_: (0, 0)),
                scratch_shapes=scratch),
            compiler_params=cparams,
        )(*operands)
        return logits, None

    kern = functools.partial(_fused_kernel_loss, B=B, S=S, nH=nH, D=D, eps=eps)
    logits, loss = pl.pallas_call(
        kern,
        out_shape=(jax.ShapeDtypeStruct((B, C), jnp.float32),
                   jax.ShapeDtypeStruct((1, 1), jnp.float32)),
        grid_spec=pltpu.PrefetchScalarGridSpec(
            num_scalar_prefetch=1, grid=(L,),          # labels -> SMEM scalar prefetch
            in_specs=in_specs,
            out_specs=[pl.BlockSpec((B, C), lambda l, *_: (0, 0)),
                       pl.BlockSpec((1, 1), lambda l, *_: (0, 0))],
            scratch_shapes=scratch),
        compiler_params=cparams,
    )(labels.astype(jnp.int32).reshape(B), *operands)
    return logits, loss[0, 0]


# ------------------------------ model wrapper ------------------------------- #

class ModelOutput:
    def __init__(self, logits, labels, loss=None):
        self.logits = logits
        self.labels = labels
        self.loss = loss


class BertReConfig:
    vocab_size = 128
    hidden_size = 32
    num_layers = 2
    num_heads = 4
    intermediate_size = 64
    max_position_embeddings = 16
    type_vocab_size = 2
    num_labels = 5
    layer_norm_eps = 1e-12


def init_params(cfg, key):
    """Deterministic synthetic f32 'checkpoint' (separate q/k/v, like HF BERT)."""
    def nrm(k, shape, scale=0.02):
        return scale * jax.random.normal(k, shape, dtype=jnp.float32)

    keys = iter(jax.random.split(key, 8 + cfg.num_layers * 16))
    H, I = cfg.hidden_size, cfg.intermediate_size
    p = {
        "word_emb": nrm(next(keys), (cfg.vocab_size, H)),
        "pos_emb": nrm(next(keys), (cfg.max_position_embeddings, H)),
        "type_emb": nrm(next(keys), (cfg.type_vocab_size, H)),
        "emb_ln_g": jnp.ones((H,), jnp.float32),
        "emb_ln_b": jnp.zeros((H,), jnp.float32),
        "pool_w": nrm(next(keys), (H, H)),
        "pool_b": jnp.zeros((H,), jnp.float32),
        "cls_w": nrm(next(keys), (H, cfg.num_labels)),
        "cls_b": jnp.zeros((cfg.num_labels,), jnp.float32),
        "layers": [],
    }
    for _ in range(cfg.num_layers):
        p["layers"].append({
            "wq": nrm(next(keys), (H, H)), "bq": jnp.zeros((H,), jnp.float32),
            "wk": nrm(next(keys), (H, H)), "bk": jnp.zeros((H,), jnp.float32),
            "wv": nrm(next(keys), (H, H)), "bv": jnp.zeros((H,), jnp.float32),
            "wo": nrm(next(keys), (H, H)), "bo": jnp.zeros((H,), jnp.float32),
            "attn_ln_g": jnp.ones((H,), jnp.float32),
            "attn_ln_b": jnp.zeros((H,), jnp.float32),
            "w1": nrm(next(keys), (H, I)), "b1": jnp.zeros((I,), jnp.float32),
            "w2": nrm(next(keys), (I, H)), "b2": jnp.zeros((H,), jnp.float32),
            "out_ln_g": jnp.ones((H,), jnp.float32),
            "out_ln_b": jnp.zeros((H,), jnp.float32),
        })
    return p


class BertRe:
    def __init__(self, cfg, params):
        self.cfg = cfg
        self.hidden_size = cfg.hidden_size
        self.params = self._preprocess(params, cfg)

    @staticmethod
    def _preprocess(p, cfg):
        """One-time weight prep: fold 1/sqrt(D) into Q weight/bias, fuse Q/K/V into a
        single (H, 3H) weight, reshape the attention out-proj to per-head (nH, D, H),
        cast matmul weights to bf16, stack all per-layer tensors on a leading L axis,
        and reshape biases / LN params to (1, N) rows."""
        H = cfg.hidden_size
        nH = cfg.num_heads
        D = H // nH
        scale = 1.0 / float(D) ** 0.5
        w = lambda a: a.astype(_MXU_DTYPE)
        row = lambda a: a.reshape(1, -1).astype(jnp.float32)
        layers = p["layers"]
        stack = lambda fn: jnp.stack([fn(lp) for lp in layers], axis=0)

        return {
            "word_emb": p["word_emb"],
            "pos_emb": p["pos_emb"],
            "type_emb": p["type_emb"],
            "emb_ln_g": row(p["emb_ln_g"]), "emb_ln_b": row(p["emb_ln_b"]),
            "pool_w": w(p["pool_w"]), "pool_b": row(p["pool_b"]),
            "cls_w": w(p["cls_w"]), "cls_b": row(p["cls_b"]),
            # stacked per-layer weights (leading axis = layer index, streamed by grid)
            "wqkv": stack(lambda lp: w(jnp.concatenate(
                [lp["wq"] * scale, lp["wk"], lp["wv"]], axis=1))),      # (L, H, 3H)
            "bqkv": stack(lambda lp: row(jnp.concatenate(
                [lp["bq"] * scale, lp["bk"], lp["bv"]]))),              # (L, 1, 3H)
            "wo3": stack(lambda lp: w(lp["wo"]).reshape(nH, D, H)),     # (L, nH, D, H)
            "bo": stack(lambda lp: row(lp["bo"])),
            "ln1_g": stack(lambda lp: row(lp["attn_ln_g"])),
            "ln1_b": stack(lambda lp: row(lp["attn_ln_b"])),
            "w1": stack(lambda lp: w(lp["w1"])),
            "b1": stack(lambda lp: row(lp["b1"])),
            "w2": stack(lambda lp: w(lp["w2"])),
            "b2": stack(lambda lp: row(lp["b2"])),
            "ln2_g": stack(lambda lp: row(lp["out_ln_g"])),
            "ln2_b": stack(lambda lp: row(lp["out_ln_b"])),
        }

    def forward(self, input_ids, attention_mask, token_type_ids, labels=None):
        del attention_mask, token_type_ids   # accepted but unused (matches torch code)
        cfg, p = self.cfg, self.params
        B, S = input_ids.shape
        H = cfg.hidden_size

        # Embedding gather is data-dependent -> left to XLA (fuses with the adds).
        # token_type_ids / attention_mask are not forwarded by the torch module, so
        # token types default to 0 and the attention mask to all-ones.
        x2d = (jnp.take(p["word_emb"], input_ids, axis=0)
               + p["pos_emb"][None, :S, :]
               + p["type_emb"][0][None, None, :]).reshape(B * S, H)

        logits, loss = bert_re_fused(
            x2d, p, labels, B=B, S=S, nH=cfg.num_heads,
            eps=cfg.layer_norm_eps, num_labels=cfg.num_labels)
        return ModelOutput(logits, labels, loss)


# ----------------------------------- main ----------------------------------- #

if __name__ == "__main__":
    cfg = BertReConfig()
    key = jax.random.PRNGKey(0)
    kp, ki, kl = jax.random.split(key, 3)

    params = init_params(cfg, kp)
    model = BertRe(cfg, params)

    B, S = 2, 8
    input_ids = jax.random.randint(ki, (B, S), 0, cfg.vocab_size, dtype=jnp.int32)
    attention_mask = jnp.ones((B, S), jnp.int32)
    token_type_ids = jnp.zeros((B, S), jnp.int32)
    labels = jax.random.randint(kl, (B,), 0, cfg.num_labels, dtype=jnp.int32)

    out = model.forward(input_ids, attention_mask, token_type_ids, labels=labels)
    jax.block_until_ready(out.logits)
    jax.block_until_ready(out.loss)

    assert out.logits.shape == (B, cfg.num_labels)
    assert out.loss.shape == ()
    print("KERNEL_OK")
</pallas_src>

<mosaic_0001>
module attributes {stable_mosaic.version = 11 : i64} {
  func.func @_fused_kernel_loss(%arg0: i32, %arg1: memref<2xi32, #tpu.memory_space<smem>>, %arg2: memref<16x32xf32, #tpu.memory_space<vmem>>, %arg3: memref<1x32xf32, #tpu.memory_space<vmem>>, %arg4: memref<1x32xf32, #tpu.memory_space<vmem>>, %arg5: memref<1x32x96xbf16, #tpu.memory_space<vmem>>, %arg6: memref<1x1x96xf32, #tpu.memory_space<vmem>>, %arg7: memref<1x4x8x32xbf16, #tpu.memory_space<vmem>>, %arg8: memref<1x1x32xf32, #tpu.memory_space<vmem>>, %arg9: memref<1x1x32xf32, #tpu.memory_space<vmem>>, %arg10: memref<1x1x32xf32, #tpu.memory_space<vmem>>, %arg11: memref<1x32x64xbf16, #tpu.memory_space<vmem>>, %arg12: memref<1x1x64xf32, #tpu.memory_space<vmem>>, %arg13: memref<1x64x32xbf16, #tpu.memory_space<vmem>>, %arg14: memref<1x1x32xf32, #tpu.memory_space<vmem>>, %arg15: memref<1x1x32xf32, #tpu.memory_space<vmem>>, %arg16: memref<1x1x32xf32, #tpu.memory_space<vmem>>, %arg17: memref<32x32xbf16, #tpu.memory_space<vmem>>, %arg18: memref<1x32xf32, #tpu.memory_space<vmem>>, %arg19: memref<32x5xbf16, #tpu.memory_space<vmem>>, %arg20: memref<1x5xf32, #tpu.memory_space<vmem>>, %arg21: memref<2x5xf32, #tpu.memory_space<vmem>>, %arg22: memref<1x1xf32, #tpu.memory_space<vmem>>, %arg23: memref<16x32xf32, #tpu.memory_space<vmem>>) attributes {dimension_semantics = [#tpu.dimension_semantics<arbitrary>], iteration_bounds = array<i64: 2>, scalar_prefetch = 1 : i64, scratch_operands = 1 : i64, tpu.core_type = #tpu.core_type<tc>, window_params = [{pipeline_mode = #tpu.pipeline_mode<synchronous>, transform_indices = @transform_0, window_bounds = array<i64: 16, 32>}, {pipeline_mode = #tpu.pipeline_mode<synchronous>, transform_indices = @transform_1, window_bounds = array<i64: 1, 32>}, {pipeline_mode = #tpu.pipeline_mode<synchronous>, transform_indices = @transform_2, window_bounds = array<i64: 1, 32>}, {transform_indices = @transform_3, window_bounds = array<i64: 1, 32, 96>}, {transform_indices = @transform_4, window_bounds = array<i64: 1, 1, 96>}, {transform_indices = @transform_5, window_bounds = array<i64: 1, 4, 8, 32>}, {transform_indices = @transform_6, window_bounds = array<i64: 1, 1, 32>}, {transform_indices = @transform_7, window_bounds = array<i64: 1, 1, 32>}, {transform_indices = @transform_8, window_bounds = array<i64: 1, 1, 32>}, {transform_indices = @transform_9, window_bounds = array<i64: 1, 32, 64>}, {transform_indices = @transform_10, window_bounds = array<i64: 1, 1, 64>}, {transform_indices = @transform_11, window_bounds = array<i64: 1, 64, 32>}, {transform_indices = @transform_12, window_bounds = array<i64: 1, 1, 32>}, {transform_indices = @transform_13, window_bounds = array<i64: 1, 1, 32>}, {transform_indices = @transform_14, window_bounds = array<i64: 1, 1, 32>}, {pipeline_mode = #tpu.pipeline_mode<synchronous>, transform_indices = @transform_15, window_bounds = array<i64: 32, 32>}, {pipeline_mode = #tpu.pipeline_mode<synchronous>, transform_indices = @transform_16, window_bounds = array<i64: 1, 32>}, {pipeline_mode = #tpu.pipeline_mode<synchronous>, transform_indices = @transform_17, window_bounds = array<i64: 32, 5>}, {pipeline_mode = #tpu.pipeline_mode<synchronous>, transform_indices = @transform_18, window_bounds = array<i64: 1, 5>}, {pipeline_mode = #tpu.pipeline_mode<synchronous>, transform_indices = @transform_19, window_bounds = array<i64: 2, 5>}, {pipeline_mode = #tpu.pipeline_mode<synchronous>, transform_indices = @transform_20, window_bounds = array<i64: 1, 1>}]} {
    %c0_i32 = arith.constant 0 : i32
    %0 = arith.cmpi eq, %arg0, %c0_i32 : i32
    %1 = arith.extui %0 : i1 to i32
    %c0_i32_0 = arith.constant 0 : i32
    %2 = arith.cmpi ne, %1, %c0_i32_0 : i32
    scf.if %2 {
      %c0_70 = arith.constant 0 : index
      %c0_71 = arith.constant 0 : index
      %198 = vector.load %arg2[%c0_70, %c0_71] : memref<16x32xf32, #tpu.memory_space<vmem>>, vector<16x32xf32>
      %c0_72 = arith.constant 0 : index
      %c0_73 = arith.constant 0 : index
      %199 = vector.load %arg3[%c0_72, %c0_73] : memref<1x32xf32, #tpu.memory_space<vmem>>, vector<1x32xf32>
      %c0_74 = arith.constant 0 : index
      %c0_75 = arith.constant 0 : index
      %200 = vector.load %arg4[%c0_74, %c0_75] : memref<1x32xf32, #tpu.memory_space<vmem>>, vector<1x32xf32>
      %cst_76 = arith.constant dense<0.000000e+00> : vector<16xf32>
      %201 = vector.multi_reduction <add>, %198, %cst_76 [1] : vector<16x32xf32> to vector<16xf32>
      %202 = vector.shape_cast %201 : vector<16xf32> to vector<16x1xf32>
      %cst_77 = arith.constant 3.200000e+01 : f32
      %203 = vector.broadcast %cst_77 : f32 to vector<16x1xf32>
      %204 = arith.divf %202, %203 : vector<16x1xf32>
      %205 = vector.broadcast %204 : vector<16x1xf32> to vector<16x32xf32>
      %206 = arith.subf %198, %205 : vector<16x32xf32>
      %207 = arith.mulf %206, %206 : vector<16x32xf32>
      %cst_78 = arith.constant dense<0.000000e+00> : vector<16xf32>
      %208 = vector.multi_reduction <add>, %207, %cst_78 [1] : vector<16x32xf32> to vector<16xf32>
      %209 = vector.shape_cast %208 : vector<16xf32> to vector<16x1xf32>
      %cst_79 = arith.constant 3.200000e+01 : f32
      %210 = vector.broadcast %cst_79 : f32 to vector<16x1xf32>
      %211 = arith.divf %209, %210 : vector<16x1xf32>
      %212 = vector.broadcast %204 : vector<16x1xf32> to vector<16x32xf32>
      %213 = arith.subf %198, %212 : vector<16x32xf32>
      %cst_80 = arith.constant 9.99999996E-13 : f32
      %214 = vector.broadcast %cst_80 : f32 to vector<16x1xf32>
      %215 = arith.addf %211, %214 : vector<16x1xf32>
      %216 = math.rsqrt %215 : vector<16x1xf32>
      %217 = vector.broadcast %216 : vector<16x1xf32> to vector<16x32xf32>
      %218 = arith.mulf %213, %217 : vector<16x32xf32>
      %219 = vector.broadcast %199 : vector<1x32xf32> to vector<16x32xf32>
      %220 = arith.mulf %218, %219 : vector<16x32xf32>
      %221 = vector.broadcast %200 : vector<1x32xf32> to vector<16x32xf32>
      %222 = arith.addf %220, %221 : vector<16x32xf32>
      %c0_81 = arith.constant 0 : index
      %c0_82 = arith.constant 0 : index
      %223 = vector.load %arg23[%c0_81, %c0_82] : memref<16x32xf32, #tpu.memory_space<vmem>>, vector<16x32xf32>
      tpu.vector_store %arg23[%c0_81, %c0_82], %222 {strides = array<i32>} : memref<16x32xf32, #tpu.memory_space<vmem>>, vector<16x32xf32>,
    } else {
    }
    %c0 = arith.constant 0 : index
    %c0_1 = arith.constant 0 : index
    %3 = vector.load %arg23[%c0, %c0_1] : memref<16x32xf32, #tpu.memory_space<vmem>>, vector<16x32xf32>
    %c0_2 = arith.constant 0 : index
    %c0_3 = arith.constant 0 : index
    %c0_4 = arith.constant 0 : index
    %4 = vector.load %arg5[%c0_2, %c0_3, %c0_4] : memref<1x32x96xbf16, #tpu.memory_space<vmem>>, vector<1x32x96xbf16>
    %5 = vector.shape_cast %4 : vector<1x32x96xbf16> to vector<32x96xbf16>
    %c0_5 = arith.constant 0 : index
    %c0_6 = arith.constant 0 : index
    %c0_7 = arith.constant 0 : index
    %6 = vector.load %arg6[%c0_5, %c0_6, %c0_7] : memref<1x1x96xf32, #tpu.memory_space<vmem>>, vector<1x1x96xf32>
    %7 = vector.shape_cast %6 : vector<1x1x96xf32> to vector<1x96xf32>
    %c0_8 = arith.constant 0 : index
    %c0_9 = arith.constant 0 : index
    %c0_10 = arith.constant 0 : index
    %c0_11 = arith.constant 0 : index
    %8 = vector.load %arg7[%c0_8, %c0_9, %c0_10, %c0_11] : memref<1x4x8x32xbf16, #tpu.memory_space<vmem>>, vector<1x4x8x32xbf16>
    %9 = vector.shape_cast %8 : vector<1x4x8x32xbf16> to vector<4x8x32xbf16>
    %c0_12 = arith.constant 0 : index
    %c0_13 = arith.constant 0 : index
    %c0_14 = arith.constant 0 : index
    %10 = vector.load %arg8[%c0_12, %c0_13, %c0_14] : memref<1x1x32xf32, #tpu.memory_space<vmem>>, vector<1x1x32xf32>
    %11 = vector.shape_cast %10 : vector<1x1x32xf32> to vector<1x32xf32>
    %c0_15 = arith.constant 0 : index
    %c0_16 = arith.constant 0 : index
    %c0_17 = arith.constant 0 : index
    %12 = vector.load %arg9[%c0_15, %c0_16, %c0_17] : memref<1x1x32xf32, #tpu.memory_space<vmem>>, vector<1x1x32xf32>
    %13 = vector.shape_cast %12 : vector<1x1x32xf32> to vector<1x32xf32>
    %c0_18 = arith.constant 0 : index
    %c0_19 = arith.constant 0 : index
    %c0_20 = arith.constant 0 : index
    %14 = vector.load %arg10[%c0_18, %c0_19, %c0_20] : memref<1x1x32xf32, #tpu.memory_space<vmem>>, vector<1x1x32xf32>
    %15 = vector.shape_cast %14 : vector<1x1x32xf32> to vector<1x32xf32>
    %c0_21 = arith.constant 0 : index
    %c0_22 = arith.constant 0 : index
    %c0_23 = arith.constant 0 : index
    %16 = vector.load %arg11[%c0_21, %c0_22, %c0_23] : memref<1x32x64xbf16, #tpu.memory_space<vmem>>, vector<1x32x64xbf16>
    %17 = vector.shape_cast %16 : vector<1x32x64xbf16> to vector<32x64xbf16>
    %c0_24 = arith.constant 0 : index
    %c0_25 = arith.constant 0 : index
    %c0_26 = arith.constant 0 : index
    %18 = vector.load %arg12[%c0_24, %c0_25, %c0_26] : memref<1x1x64xf32, #tpu.memory_space<vmem>>, vector<1x1x64xf32>
    %19 = vector.shape_cast %18 : vector<1x1x64xf32> to vector<1x64xf32>
    %c0_27 = arith.constant 0 : index
    %c0_28 = arith.constant 0 : index
    %c0_29 = arith.constant 0 : index
    %20 = vector.load %arg13[%c0_27, %c0_28, %c0_29] : memref<1x64x32xbf16, #tpu.memory_space<vmem>>, vector<1x64x32xbf16>
    %21 = vector.shape_cast %20 : vector<1x64x32xbf16> to vector<64x32xbf16>
    %c0_30 = arith.constant 0 : index
    %c0_31 = arith.constant 0 : index
    %c0_32 = arith.constant 0 : index
    %22 = vector.load %arg14[%c0_30, %c0_31, %c0_32] : memref<1x1x32xf32, #tpu.memory_space<vmem>>, vector<1x1x32xf32>
    %23 = vector.shape_cast %22 : vector<1x1x32xf32> to vector<1x32xf32>
    %c0_33 = arith.constant 0 : index
    %c0_34 = arith.constant 0 : index
    %c0_35 = arith.constant 0 : index
    %24 = vector.load %arg15[%c0_33, %c0_34, %c0_35] : memref<1x1x32xf32, #tpu.memory_space<vmem>>, vector<1x1x32xf32>
    %25 = vector.shape_cast %24 : vector<1x1x32xf32> to vector<1x32xf32>
    %c0_36 = arith.constant 0 : index
    %c0_37 = arith.constant 0 : index
    %c0_38 = arith.constant 0 : index
    %26 = vector.load %arg16[%c0_36, %c0_37, %c0_38] : memref<1x1x32xf32, #tpu.memory_space<vmem>>, vector<1x1x32xf32>
    %27 = vector.shape_cast %26 : vector<1x1x32xf32> to vector<1x32xf32>
    %28 = arith.truncf %3 : vector<16x32xf32> to vector<16x32xbf16>
    %cst = arith.constant dense<0.000000e+00> : vector<16x96xf32>
    %29 = tpu.matmul %28, %5, %cst {dimension_numbers = #tpu.dot_dimension_numbers<[1], [0], [0], [1], [0, 0, 1, 1], [], []>} : vector<16x32xbf16>, vector<32x96xbf16>, vector<16x96xf32> -> vector<16x96xf32>
    %30 = vector.broadcast %7 : vector<1x96xf32> to vector<16x96xf32>
    %31 = arith.addf %29, %30 : vector<16x96xf32>
    %32 = vector.extract_strided_slice %31 {offsets = [0, 0], sizes = [8, 96], strides = [1, 1]} : vector<16x96xf32> to vector<8x96xf32>
    %33 = vector.extract_strided_slice %32 {offsets = [0, 0], sizes = [8, 8], strides = [1, 1]} : vector<8x96xf32> to vector<8x8xf32>
    %34 = vector.extract_strided_slice %32 {offsets = [0, 8], sizes = [8, 8], strides = [1, 1]} : vector<8x96xf32> to vector<8x8xf32>
    %35 = vector.extract_strided_slice %32 {offsets = [0, 16], sizes = [8, 8], strides = [1, 1]} : vector<8x96xf32> to vector<8x8xf32>
    %36 = vector.extract_strided_slice %32 {offsets = [0, 24], sizes = [8, 8], strides = [1, 1]} : vector<8x96xf32> to vector<8x8xf32>
    %37 = vector.shape_cast %33 : vector<8x8xf32> to vector<1x8x8xf32>
    %38 = vector.shape_cast %34 : vector<8x8xf32> to vector<1x8x8xf32>
    %39 = vector.shape_cast %35 : vector<8x8xf32> to vector<1x8x8xf32>
    %40 = vector.shape_cast %36 : vector<8x8xf32> to vector<1x8x8xf32>
    %41 = tpu.concatenate %37, %38, %39, %40 in 0 : vector<1x8x8xf32>, vector<1x8x8xf32>, vector<1x8x8xf32>, vector<1x8x8xf32> -> vector<4x8x8xf32>
    %42 = arith.truncf %41 : vector<4x8x8xf32> to vector<4x8x8xbf16>
    %43 = vector.extract_strided_slice %32 {offsets = [0, 32], sizes = [8, 8], strides = [1, 1]} : vector<8x96xf32> to vector<8x8xf32>
    %44 = vector.extract_strided_slice %32 {offsets = [0, 40], sizes = [8, 8], strides = [1, 1]} : vector<8x96xf32> to vector<8x8xf32>
    %45 = vector.extract_strided_slice %32 {offsets = [0, 48], sizes = [8, 8], strides = [1, 1]} : vector<8x96xf32> to vector<8x8xf32>
    %46 = vector.extract_strided_slice %32 {offsets = [0, 56], sizes = [8, 8], strides = [1, 1]} : vector<8x96xf32> to vector<8x8xf32>
    %47 = vector.shape_cast %43 : vector<8x8xf32> to vector<1x8x8xf32>
    %48 = vector.shape_cast %44 : vector<8x8xf32> to vector<1x8x8xf32>
    %49 = vector.shape_cast %45 : vector<8x8xf32> to vector<1x8x8xf32>
    %50 = vector.shape_cast %46 : vector<8x8xf32> to vector<1x8x8xf32>
    %51 = tpu.concatenate %47, %48, %49, %50 in 0 : vector<1x8x8xf32>, vector<1x8x8xf32>, vector<1x8x8xf32>, vector<1x8x8xf32> -> vector<4x8x8xf32>
    %52 = arith.truncf %51 : vector<4x8x8xf32> to vector<4x8x8xbf16>
    %53 = vector.extract_strided_slice %32 {offsets = [0, 64], sizes = [8, 8], strides = [1, 1]} : vector<8x96xf32> to vector<8x8xf32>
    %54 = vector.extract_strided_slice %32 {offsets = [0, 72], sizes = [8, 8], strides = [1, 1]} : vector<8x96xf32> to vector<8x8xf32>
    %55 = vector.extract_strided_slice %32 {offsets = [0, 80], sizes = [8, 8], strides = [1, 1]} : vector<8x96xf32> to vector<8x8xf32>
    %56 = vector.extract_strided_slice %32 {offsets = [0, 88], sizes = [8, 8], strides = [1, 1]} : vector<8x96xf32> to vector<8x8xf32>
    %57 = vector.shape_cast %53 : vector<8x8xf32> to vector<1x8x8xf32>
    %58 = vector.shape_cast %54 : vector<8x8xf32> to vector<1x8x8xf32>
    %59 = vector.shape_cast %55 : vector<8x8xf32> to vector<1x8x8xf32>
    %60 = vector.shape_cast %56 : vector<8x8xf32> to vector<1x8x8xf32>
    %61 = tpu.concatenate %57, %58, %59, %60 in 0 : vector<1x8x8xf32>, vector<1x8x8xf32>, vector<1x8x8xf32>, vector<1x8x8xf32> -> vector<4x8x8xf32>
    %62 = arith.truncf %61 : vector<4x8x8xf32> to vector<4x8x8xbf16>
    "tpu.trace_start"() <{level = 10 : i32, message = "hqd,hkd->hqk"}> : () -> ()
    %cst_39 = arith.constant dense<0.000000e+00> : vector<4x8x8xf32>
    %63 = tpu.matmul %42, %52, %cst_39 {dimension_numbers = #tpu.dot_dimension_numbers<[2], [2], [1], [1], [0, 0, 0, 1, 1, 1], [0], [0]>} : vector<4x8x8xbf16>, vector<4x8x8xbf16>, vector<4x8x8xf32> -> vector<4x8x8xf32>
    "tpu.trace_stop"() : () -> ()
    %cst_40 = arith.constant dense<0xFF800000> : vector<4x8xf32>
    %64 = vector.multi_reduction <maximumf>, %63, %cst_40 [2] : vector<4x8x8xf32> to vector<4x8xf32>
    %65 = vector.shape_cast %64 : vector<4x8xf32> to vector<4x8x1xf32>
    %66 = vector.broadcast %65 : vector<4x8x1xf32> to vector<4x8x8xf32>
    %67 = arith.subf %63, %66 : vector<4x8x8xf32>
    %68 = math.exp %67 : vector<4x8x8xf32>
    %cst_41 = arith.constant dense<0.000000e+00> : vector<4x8xf32>
    %69 = vector.multi_reduction <add>, %68, %cst_41 [2] : vector<4x8x8xf32> to vector<4x8xf32>
    %70 = vector.shape_cast %69 : vector<4x8xf32> to vector<4x8x1xf32>
    %71 = vector.broadcast %70 : vector<4x8x1xf32> to vector<4x8x8xf32>
    %72 = arith.divf %68, %71 : vector<4x8x8xf32>
    %73 = arith.truncf %72 : vector<4x8x8xf32> to vector<4x8x8xbf16>
    "tpu.trace_start"() <{level = 10 : i32, message = "hqk,hkd->hqd"}> : () -> ()
    %cst_42 = arith.constant dense<0.000000e+00> : vector<4x8x8xf32>
    %74 = tpu.matmul %73, %62, %cst_42 {dimension_numbers = #tpu.dot_dimension_numbers<[2], [1], [1], [2], [0, 0, 0, 1, 1, 2], [0], [0]>} : vector<4x8x8xbf16>, vector<4x8x8xbf16>, vector<4x8x8xf32> -> vector<4x8x8xf32>
    "tpu.trace_stop"() : () -> ()
    %75 = arith.truncf %74 : vector<4x8x8xf32> to vector<4x8x8xbf16>
    "tpu.trace_start"() <{level = 10 : i32, message = "hqd,hdo->hqo"}> : () -> ()
    %cst_43 = arith.constant dense<0.000000e+00> : vector<4x8x32xf32>
    %76 = tpu.matmul %75, %9, %cst_43 {dimension_numbers = #tpu.dot_dimension_numbers<[2], [1], [1], [2], [0, 0, 0, 1, 1, 2], [0], [0]>} : vector<4x8x8xbf16>, vector<4x8x32xbf16>, vector<4x8x32xf32> -> vector<4x8x32xf32>
    "tpu.trace_stop"() : () -> ()
    %cst_44 = arith.constant dense<0.000000e+00> : vector<8x32xf32>
    %77 = vector.multi_reduction <add>, %76, %cst_44 [0] : vector<4x8x32xf32> to vector<8x32xf32>
    %78 = vector.extract_strided_slice %31 {offsets = [8, 0], sizes = [8, 96], strides = [1, 1]} : vector<16x96xf32> to vector<8x96xf32>
    %79 = vector.extract_strided_slice %78 {offsets = [0, 0], sizes = [8, 8], strides = [1, 1]} : vector<8x96xf32> to vector<8x8xf32>
    %80 = vector.extract_strided_slice %78 {offsets = [0, 8], sizes = [8, 8], strides = [1, 1]} : vector<8x96xf32> to vector<8x8xf32>
    %81 = vector.extract_strided_slice %78 {offsets = [0, 16], sizes = [8, 8], strides = [1, 1]} : vector<8x96xf32> to vector<8x8xf32>
    %82 = vector.extract_strided_slice %78 {offsets = [0, 24], sizes = [8, 8], strides = [1, 1]} : vector<8x96xf32> to vector<8x8xf32>
    %83 = vector.shape_cast %79 : vector<8x8xf32> to vector<1x8x8xf32>
    %84 = vector.shape_cast %80 : vector<8x8xf32> to vector<1x8x8xf32>
    %85 = vector.shape_cast %81 : vector<8x8xf32> to vector<1x8x8xf32>
    %86 = vector.shape_cast %82 : vector<8x8xf32> to vector<1x8x8xf32>
    %87 = tpu.concatenate %83, %84, %85, %86 in 0 : vector<1x8x8xf32>, vector<1x8x8xf32>, vector<1x8x8xf32>, vector<1x8x8xf32> -> vector<4x8x8xf32>
    %88 = arith.truncf %87 : vector<4x8x8xf32> to vector<4x8x8xbf16>
    %89 = vector.extract_strided_slice %78 {offsets = [0, 32], sizes = [8, 8], strides = [1, 1]} : vector<8x96xf32> to vector<8x8xf32>
    %90 = vector.extract_strided_slice %78 {offsets = [0, 40], sizes = [8, 8], strides = [1, 1]} : vector<8x96xf32> to vector<8x8xf32>
    %91 = vector.extract_strided_slice %78 {offsets = [0, 48], sizes = [8, 8], strides = [1, 1]} : vector<8x96xf32> to vector<8x8xf32>
    %92 = vector.extract_strided_slice %78 {offsets = [0, 56], sizes = [8, 8], strides = [1, 1]} : vector<8x96xf32> to vector<8x8xf32>
    %93 = vector.shape_cast %89 : vector<8x8xf32> to vector<1x8x8xf32>
    %94 = vector.shape_cast %90 : vector<8x8xf32> to vector<1x8x8xf32>
    %95 = vector.shape_cast %91 : vector<8x8xf32> to vector<1x8x8xf32>
    %96 = vector.shape_cast %92 : vector<8x8xf32> to vector<1x8x8xf32>
    %97 = tpu.concatenate %93, %94, %95, %96 in 0 : vector<1x8x8xf32>, vector<1x8x8xf32>, vector<1x8x8xf32>, vector<1x8x8xf32> -> vector<4x8x8xf32>
    %98 = arith.truncf %97 : vector<4x8x8xf32> to vector<4x8x8xbf16>
    %99 = vector.extract_strided_slice %78 {offsets = [0, 64], sizes = [8, 8], strides = [1, 1]} : vector<8x96xf32> to vector<8x8xf32>
    %100 = vector.extract_strided_slice %78 {offsets = [0, 72], sizes = [8, 8], strides = [1, 1]} : vector<8x96xf32> to vector<8x8xf32>
    %101 = vector.extract_strided_slice %78 {offsets = [0, 80], sizes = [8, 8], strides = [1, 1]} : vector<8x96xf32> to vector<8x8xf32>
    %102 = vector.extract_strided_slice %78 {offsets = [0, 88], sizes = [8, 8], strides = [1, 1]} : vector<8x96xf32> to vector<8x8xf32>
    %103 = vector.shape_cast %99 : vector<8x8xf32> to vector<1x8x8xf32>
    %104 = vector.shape_cast %100 : vector<8x8xf32> to vector<1x8x8xf32>
    %105 = vector.shape_cast %101 : vector<8x8xf32> to vector<1x8x8xf32>
    %106 = vector.shape_cast %102 : vector<8x8xf32> to vector<1x8x8xf32>
    %107 = tpu.concatenate %103, %104, %105, %106 in 0 : vector<1x8x8xf32>, vector<1x8x8xf32>, vector<1x8x8xf32>, vector<1x8x8xf32> -> vector<4x8x8xf32>
    %108 = arith.truncf %107 : vector<4x8x8xf32> to vector<4x8x8xbf16>
    "tpu.trace_start"() <{level = 10 : i32, message = "hqd,hkd->hqk"}> : () -> ()
    %cst_45 = arith.constant dense<0.000000e+00> : vector<4x8x8xf32>
    %109 = tpu.matmul %88, %98, %cst_45 {dimension_numbers = #tpu.dot_dimension_numbers<[2], [2], [1], [1], [0, 0, 0, 1, 1, 1], [0], [0]>} : vector<4x8x8xbf16>, vector<4x8x8xbf16>, vector<4x8x8xf32> -> vector<4x8x8xf32>
    "tpu.trace_stop"() : () -> ()
    %cst_46 = arith.constant dense<0xFF800000> : vector<4x8xf32>
    %110 = vector.multi_reduction <maximumf>, %109, %cst_46 [2] : vector<4x8x8xf32> to vector<4x8xf32>
    %111 = vector.shape_cast %110 : vector<4x8xf32> to vector<4x8x1xf32>
    %112 = vector.broadcast %111 : vector<4x8x1xf32> to vector<4x8x8xf32>
    %113 = arith.subf %109, %112 : vector<4x8x8xf32>
    %114 = math.exp %113 : vector<4x8x8xf32>
    %cst_47 = arith.constant dense<0.000000e+00> : vector<4x8xf32>
    %115 = vector.multi_reduction <add>, %114, %cst_47 [2] : vector<4x8x8xf32> to vector<4x8xf32>
    %116 = vector.shape_cast %115 : vector<4x8xf32> to vector<4x8x1xf32>
    %117 = vector.broadcast %116 : vector<4x8x1xf32> to vector<4x8x8xf32>
    %118 = arith.divf %114, %117 : vector<4x8x8xf32>
    %119 = arith.truncf %118 : vector<4x8x8xf32> to vector<4x8x8xbf16>
    "tpu.trace_start"() <{level = 10 : i32, message = "hqk,hkd->hqd"}> : () -> ()
    %cst_48 = arith.constant dense<0.000000e+00> : vector<4x8x8xf32>
    %120 = tpu.matmul %119, %108, %cst_48 {dimension_numbers = #tpu.dot_dimension_numbers<[2], [1], [1], [2], [0, 0, 0, 1, 1, 2], [0], [0]>} : vector<4x8x8xbf16>, vector<4x8x8xbf16>, vector<4x8x8xf32> -> vector<4x8x8xf32>
    "tpu.trace_stop"() : () -> ()
    %121 = arith.truncf %120 : vector<4x8x8xf32> to vector<4x8x8xbf16>
    "tpu.trace_start"() <{level = 10 : i32, message = "hqd,hdo->hqo"}> : () -> ()
    %cst_49 = arith.constant dense<0.000000e+00> : vector<4x8x32xf32>
    %122 = tpu.matmul %121, %9, %cst_49 {dimension_numbers = #tpu.dot_dimension_numbers<[2], [1], [1], [2], [0, 0, 0, 1, 1, 2], [0], [0]>} : vector<4x8x8xbf16>, vector<4x8x32xbf16>, vector<4x8x32xf32> -> vector<4x8x32xf32>
    "tpu.trace_stop"() : () -> ()
    %cst_50 = arith.constant dense<0.000000e+00> : vector<8x32xf32>
    %123 = vector.multi_reduction <add>, %122, %cst_50 [0] : vector<4x8x32xf32> to vector<8x32xf32>
    %124 = tpu.concatenate %77, %123 in 0 : vector<8x32xf32>, vector<8x32xf32> -> vector<16x32xf32>
    %125 = vector.broadcast %11 : vector<1x32xf32> to vector<16x32xf32>
    %126 = arith.addf %124, %125 : vector<16x32xf32>
    %127 = arith.addf %3, %126 : vector<16x32xf32>
    %cst_51 = arith.constant dense<0.000000e+00> : vector<16xf32>
    %128 = vector.multi_reduction <add>, %127, %cst_51 [1] : vector<16x32xf32> to vector<16xf32>
    %129 = vector.shape_cast %128 : vector<16xf32> to vector<16x1xf32>
    %cst_52 = arith.constant 3.200000e+01 : f32
    %130 = vector.broadcast %cst_52 : f32 to vector<16x1xf32>
    %131 = arith.divf %129, %130 : vector<16x1xf32>
    %132 = vector.broadcast %131 : vector<16x1xf32> to vector<16x32xf32>
    %133 = arith.subf %127, %132 : vector<16x32xf32>
    %134 = arith.mulf %133, %133 : vector<16x32xf32>
    %cst_53 = arith.constant dense<0.000000e+00> : vector<16xf32>
    %135 = vector.multi_reduction <add>, %134, %cst_53 [1] : vector<16x32xf32> to vector<16xf32>
    %136 = vector.shape_cast %135 : vector<16xf32> to vector<16x1xf32>
    %cst_54 = arith.constant 3.200000e+01 : f32
    %137 = vector.broadcast %cst_54 : f32 to vector<16x1xf32>
    %138 = arith.divf %136, %137 : vector<16x1xf32>
    %139 = vector.broadcast %131 : vector<16x1xf32> to vector<16x32xf32>
    %140 = arith.subf %127, %139 : vector<16x32xf32>
    %cst_55 = arith.constant 9.99999996E-13 : f32
    %141 = vector.broadcast %cst_55 : f32 to vector<16x1xf32>
    %142 = arith.addf %138, %141 : vector<16x1xf32>
    %143 = math.rsqrt %142 : vector<16x1xf32>
    %144 = vector.broadcast %143 : vector<16x1xf32> to vector<16x32xf32>
    %145 = arith.mulf %140, %144 : vector<16x32xf32>
    %146 = vector.broadcast %13 : vector<1x32xf32> to vector<16x32xf32>
    %147 = arith.mulf %145, %146 : vector<16x32xf32>
    %148 = vector.broadcast %15 : vector<1x32xf32> to vector<16x32xf32>
    %149 = arith.addf %147, %148 : vector<16x32xf32>
    %150 = arith.truncf %149 : vector<16x32xf32> to vector<16x32xbf16>
    %cst_56 = arith.constant dense<0.000000e+00> : vector<16x64xf32>
    %151 = tpu.matmul %150, %17, %cst_56 {dimension_numbers = #tpu.dot_dimension_numbers<[1], [0], [0], [1], [0, 0, 1, 1], [], []>} : vector<16x32xbf16>, vector<32x64xbf16>, vector<16x64xf32> -> vector<16x64xf32>
    %152 = vector.broadcast %19 : vector<1x64xf32> to vector<16x64xf32>
    %153 = arith.addf %151, %152 : vector<16x64xf32>
    %154 = arith.mulf %153, %153 : vector<16x64xf32>
    %155 = arith.mulf %153, %154 : vector<16x64xf32>
    %cst_57 = arith.constant 4.471500e-02 : f32
    %156 = vector.broadcast %cst_57 : f32 to vector<16x64xf32>
    %157 = arith.mulf %156, %155 : vector<16x64xf32>
    %158 = arith.addf %153, %157 : vector<16x64xf32>
    %cst_58 = arith.constant 0.797884583 : f32
    %159 = vector.broadcast %cst_58 : f32 to vector<16x64xf32>
    %160 = arith.mulf %159, %158 : vector<16x64xf32>
    %161 = math.tanh %160 : vector<16x64xf32>
    %cst_59 = arith.constant 1.000000e+00 : f32
    %162 = vector.broadcast %cst_59 : f32 to vector<16x64xf32>
    %163 = arith.addf %162, %161 : vector<16x64xf32>
    %cst_60 = arith.constant 5.000000e-01 : f32
    %164 = vector.broadcast %cst_60 : f32 to vector<16x64xf32>
    %165 = arith.mulf %164, %163 : vector<16x64xf32>
    %166 = arith.mulf %153, %165 : vector<16x64xf32>
    %167 = arith.truncf %166 : vector<16x64xf32> to vector<16x64xbf16>
    %cst_61 = arith.constant dense<0.000000e+00> : vector<16x32xf32>
    %168 = tpu.matmul %167, %21, %cst_61 {dimension_numbers = #tpu.dot_dimension_numbers<[1], [0], [0], [1], [0, 0, 1, 1], [], []>} : vector<16x64xbf16>, vector<64x32xbf16>, vector<16x32xf32> -> vector<16x32xf32>
    %169 = vector.broadcast %23 : vector<1x32xf32> to vector<16x32xf32>
    %170 = arith.addf %168, %169 : vector<16x32xf32>
    %171 = arith.addf %149, %170 : vector<16x32xf32>
    %cst_62 = arith.constant dense<0.000000e+00> : vector<16xf32>
    %172 = vector.multi_reduction <add>, %171, %cst_62 [1] : vector<16x32xf32> to vector<16xf32>
    %173 = vector.shape_cast %172 : vector<16xf32> to vector<16x1xf32>
    %cst_63 = arith.constant 3.200000e+01 : f32
    %174 = vector.broadcast %cst_63 : f32 to vector<16x1xf32>
    %175 = arith.divf %173, %174 : vector<16x1xf32>
    %176 = vector.broadcast %175 : vector<16x1xf32> to vector<16x32xf32>
    %177 = arith.subf %171, %176 : vector<16x32xf32>
    %178 = arith.mulf %177, %177 : vector<16x32xf32>
    %cst_64 = arith.constant dense<0.000000e+00> : vector<16xf32>
    %179 = vector.multi_reduction <add>, %178, %cst_64 [1] : vector<16x32xf32> to vector<16xf32>
    %180 = vector.shape_cast %179 : vector<16xf32> to vector<16x1xf32>
    %cst_65 = arith.constant 3.200000e+01 : f32
    %181 = vector.broadcast %cst_65 : f32 to vector<16x1xf32>
    %182 = arith.divf %180, %181 : vector<16x1xf32>
    %183 = vector.broadcast %175 : vector<16x1xf32> to vector<16x32xf32>
    %184 = arith.subf %171, %183 : vector<16x32xf32>
    %cst_66 = arith.constant 9.99999996E-13 : f32
    %185 = vector.broadcast %cst_66 : f32 to vector<16x1xf32>
    %186 = arith.addf %182, %185 : vector<16x1xf32>
    %187 = math.rsqrt %186 : vector<16x1xf32>
    %188 = vector.broadcast %187 : vector<16x1xf32> to vector<16x32xf32>
    %189 = arith.mulf %184, %188 : vector<16x32xf32>
    %190 = vector.broadcast %25 : vector<1x32xf32> to vector<16x32xf32>
    %191 = arith.mulf %189, %190 : vector<16x32xf32>
    %192 = vector.broadcast %27 : vector<1x32xf32> to vector<16x32xf32>
    %193 = arith.addf %191, %192 : vector<16x32xf32>
    %c0_67 = arith.constant 0 : index
    %c0_68 = arith.constant 0 : index
    %194 = vector.load %arg23[%c0_67, %c0_68] : memref<16x32xf32, #tpu.memory_space<vmem>>, vector<16x32xf32>
    tpu.vector_store %arg23[%c0_67, %c0_68], %193 {strides = array<i32>} : memref<16x32xf32, #tpu.memory_space<vmem>>, vector<16x32xf32>,
    %c1_i32 = arith.constant 1 : i32
    %195 = arith.cmpi eq, %arg0, %c1_i32 : i32
    %196 = arith.extui %195 : i1 to i32
    %c0_i32_69 = arith.constant 0 : i32
    %197 = arith.cmpi ne, %196, %c0_i32_69 : i32
    scf.if %197 {
      %198 = vector.extract_strided_slice %193 {offsets = [0, 0], sizes = [1, 32], strides = [1, 1]} : vector<16x32xf32> to vector<1x32xf32>
      %199 = vector.extract_strided_slice %193 {offsets = [8, 0], sizes = [1, 32], strides = [1, 1]} : vector<16x32xf32> to vector<1x32xf32>
      %200 = tpu.concatenate %198, %199 in 0 : vector<1x32xf32>, vector<1x32xf32> -> vector<2x32xf32>
      %201 = arith.truncf %200 : vector<2x32xf32> to vector<2x32xbf16>
      %c0_70 = arith.constant 0 : index
      %c0_71 = arith.constant 0 : index
      %202 = vector.load %arg17[%c0_70, %c0_71] : memref<32x32xbf16, #tpu.memory_space<vmem>>, vector<32x32xbf16>
      %cst_72 = arith.constant dense<0.000000e+00> : vector<2x32xf32>
      %203 = tpu.matmul %201, %202, %cst_72 {dimension_numbers = #tpu.dot_dimension_numbers<[1], [0], [0], [1], [0, 0, 1, 1], [], []>} : vector<2x32xbf16>, vector<32x32xbf16>, vector<2x32xf32> -> vector<2x32xf32>
      %c0_73 = arith.constant 0 : index
      %c0_74 = arith.constant 0 : index
      %204 = vector.load %arg18[%c0_73, %c0_74] : memref<1x32xf32, #tpu.memory_space<vmem>>, vector<1x32xf32>
      %205 = vector.broadcast %204 : vector<1x32xf32> to vector<2x32xf32>
      %206 = arith.addf %203, %205 : vector<2x32xf32>
      %207 = math.tanh %206 : vector<2x32xf32>
      %208 = arith.truncf %207 : vector<2x32xf32> to vector<2x32xbf16>
      %c0_75 = arith.constant 0 : index
      %c0_76 = arith.constant 0 : index
      %209 = vector.load %arg19[%c0_75, %c0_76] : memref<32x5xbf16, #tpu.memory_space<vmem>>, vector<32x5xbf16>
      %cst_77 = arith.constant dense<0.000000e+00> : vector<2x5xf32>
      %210 = tpu.matmul %208, %209, %cst_77 {dimension_numbers = #tpu.dot_dimension_numbers<[1], [0], [0], [1], [0, 0, 1, 1], [], []>} : vector<2x32xbf16>, vector<32x5xbf16>, vector<2x5xf32> -> vector<2x5xf32>
      %c0_78 = arith.constant 0 : index
      %c0_79 = arith.constant 0 : index
      %211 = vector.load %arg20[%c0_78, %c0_79] : memref<1x5xf32, #tpu.memory_space<vmem>>, vector<1x5xf32>
      %212 = vector.broadcast %211 : vector<1x5xf32> to vector<2x5xf32>
      %213 = arith.addf %210, %212 : vector<2x5xf32>
      %c0_80 = arith.constant 0 : index
      %c0_81 = arith.constant 0 : index
      %214 = vector.load %arg21[%c0_80, %c0_81] : memref<2x5xf32, #tpu.memory_space<vmem>>, vector<2x5xf32>
      tpu.vector_store %arg21[%c0_80, %c0_81], %213 {strides = array<i32>} : memref<2x5xf32, #tpu.memory_space<vmem>>, vector<2x5xf32>,
      %215 = tpu.iota {dimensions = array<i32: 1>} : vector<1x5xi32>
      %cst_82 = arith.constant 0.000000e+00 : f32
      %216 = vector.broadcast %cst_82 : f32 to vector<1x1xf32>
      %cst_83 = arith.constant 0.000000e+00 : f32
      %217 = vector.broadcast %cst_83 : f32 to vector<1x1xf32>
      %218 = vector.extract_strided_slice %213 {offsets = [0, 0], sizes = [1, 5], strides = [1, 1]} : vector<2x5xf32> to vector<1x5xf32>
      %c0_84 = arith.constant 0 : index
      %219 = memref.load %arg1[%c0_84] : memref<2xi32, #tpu.memory_space<smem>>
      %cst_85 = arith.constant dense<0xFF800000> : vector<1xf32>
      %220 = vector.multi_reduction <maximumf>, %218, %cst_85 [1] : vector<1x5xf32> to vector<1xf32>
      %221 = vector.shape_cast %220 : vector<1xf32> to vector<1x1xf32>
      %222 = vector.broadcast %221 : vector<1x1xf32> to vector<1x5xf32>
      %223 = arith.subf %218, %222 : vector<1x5xf32>
      %224 = math.exp %223 : vector<1x5xf32>
      %cst_86 = arith.constant dense<0.000000e+00> : vector<1xf32>
      %225 = vector.multi_reduction <add>, %224, %cst_86 [1] : vector<1x5xf32> to vector<1xf32>
      %226 = vector.shape_cast %225 : vector<1xf32> to vector<1x1xf32>
      %227 = math.log %226 : vector<1x1xf32>
      %228 = arith.addf %227, %221 : vector<1x1xf32>
      %229 = vector.broadcast %219 : i32 to vector<1x5xi32>
      %230 = arith.cmpi eq, %215, %229 : vector<1x5xi32>
      %cst_87 = arith.constant 0.000000e+00 : f32
      %231 = vector.broadcast %cst_87 : f32 to vector<1x5xf32>
      %232 = arith.select %230, %218, %231 : vector<1x5xi1>, vector<1x5xf32>
      %cst_88 = arith.constant dense<0.000000e+00> : vector<1xf32>
      %233 = vector.multi_reduction <add>, %232, %cst_88 [1] : vector<1x5xf32> to vector<1xf32>
      %234 = vector.shape_cast %233 : vector<1xf32> to vector<1x1xf32>
      %c-100_i32 = arith.constant -100 : i32
      %235 = arith.cmpi ne, %219, %c-100_i32 : i32
      %236 = arith.extui %235 : i1 to i32
      %237 = arith.sitofp %236 : i32 to f32
      %238 = arith.subf %228, %234 : vector<1x1xf32>
      %239 = vector.broadcast %237 : f32 to vector<1x1xf32>
      %240 = arith.mulf %238, %239 : vector<1x1xf32>
      %241 = arith.addf %216, %240 : vector<1x1xf32>
      %242 = vector.broadcast %237 : f32 to vector<1x1xf32>
      %243 = arith.addf %217, %242 : vector<1x1xf32>
      %244 = vector.extract_strided_slice %213 {offsets = [1, 0], sizes = [1, 5], strides = [1, 1]} : vector<2x5xf32> to vector<1x5xf32>
      %c1 = arith.constant 1 : index
      %245 = memref.load %arg1[%c1] : memref<2xi32, #tpu.memory_space<smem>>
      %cst_89 = arith.constant dense<0xFF800000> : vector<1xf32>
      %246 = vector.multi_reduction <maximumf>, %244, %cst_89 [1] : vector<1x5xf32> to vector<1xf32>
      %247 = vector.shape_cast %246 : vector<1xf32> to vector<1x1xf32>
      %248 = vector.broadcast %247 : vector<1x1xf32> to vector<1x5xf32>
      %249 = arith.subf %244, %248 : vector<1x5xf32>
      %250 = math.exp %249 : vector<1x5xf32>
      %cst_90 = arith.constant dense<0.000000e+00> : vector<1xf32>
      %251 = vector.multi_reduction <add>, %250, %cst_90 [1] : vector<1x5xf32> to vector<1xf32>
      %252 = vector.shape_cast %251 : vector<1xf32> to vector<1x1xf32>
      %253 = math.log %252 : vector<1x1xf32>
      %254 = arith.addf %253, %247 : vector<1x1xf32>
      %255 = vector.broadcast %245 : i32 to vector<1x5xi32>
      %256 = arith.cmpi eq, %215, %255 : vector<1x5xi32>
      %cst_91 = arith.constant 0.000000e+00 : f32
      %257 = vector.broadcast %cst_91 : f32 to vector<1x5xf32>
      %258 = arith.select %256, %244, %257 : vector<1x5xi1>, vector<1x5xf32>
      %cst_92 = arith.constant dense<0.000000e+00> : vector<1xf32>
      %259 = vector.multi_reduction <add>, %258, %cst_92 [1] : vector<1x5xf32> to vector<1xf32>
      %260 = vector.shape_cast %259 : vector<1xf32> to vector<1x1xf32>
      %c-100_i32_93 = arith.constant -100 : i32
      %261 = arith.cmpi ne, %245, %c-100_i32_93 : i32
      %262 = arith.extui %261 : i1 to i32
      %263 = arith.sitofp %262 : i32 to f32
      %264 = arith.subf %254, %260 : vector<1x1xf32>
      %265 = vector.broadcast %263 : f32 to vector<1x1xf32>
      %266 = arith.mulf %264, %265 : vector<1x1xf32>
      %267 = arith.addf %241, %266 : vector<1x1xf32>
      %268 = vector.broadcast %263 : f32 to vector<1x1xf32>
      %269 = arith.addf %243, %268 : vector<1x1xf32>
      %270 = arith.divf %267, %269 : vector<1x1xf32>
      %c0_94 = arith.constant 0 : index
      %c0_95 = arith.constant 0 : index
      %271 = vector.load %arg22[%c0_94, %c0_95] : memref<1x1xf32, #tpu.memory_space<vmem>>, vector<1x1xf32>
      tpu.vector_store %arg22[%c0_94, %c0_95], %270 {strides = array<i32>} : memref<1x1xf32, #tpu.memory_space<vmem>>, vector<1x1xf32>,
    } else {
    }
    return
  }
  func.func @transform_0(%arg0: i32, %arg1: memref<2xi32, #tpu.memory_space<smem>>) -> (i32, i32) {
    %c0_i32 = arith.constant 0 : i32
    %c0_i32_0 = arith.constant 0 : i32
    %c0_i32_1 = arith.constant 0 : i32
    return %c0_i32, %c0_i32_0 : i32, i32
  }
  func.func @transform_1(%arg0: i32, %arg1: memref<2xi32, #tpu.memory_space<smem>>) -> (i32, i32) {
    %c0_i32 = arith.constant 0 : i32
    %c0_i32_0 = arith.constant 0 : i32
    %c0_i32_1 = arith.constant 0 : i32
    return %c0_i32, %c0_i32_0 : i32, i32
  }
  func.func @transform_2(%arg0: i32, %arg1: memref<2xi32, #tpu.memory_space<smem>>) -> (i32, i32) {
    %c0_i32 = arith.constant 0 : i32
    %c0_i32_0 = arith.constant 0 : i32
    %c0_i32_1 = arith.constant 0 : i32
    return %c0_i32, %c0_i32_0 : i32, i32
  }
  func.func @transform_3(%arg0: i32, %arg1: memref<2xi32, #tpu.memory_space<smem>>) -> (i32, i32, i32) {
    %c0_i32 = arith.constant 0 : i32
    %c0_i32_0 = arith.constant 0 : i32
    %c0_i32_1 = arith.constant 0 : i32
    return %arg0, %c0_i32, %c0_i32_0 : i32, i32, i32
  }
  func.func @transform_4(%arg0: i32, %arg1: memref<2xi32, #tpu.memory_space<smem>>) -> (i32, i32, i32) {
    %c0_i32 = arith.constant 0 : i32
    %c0_i32_0 = arith.constant 0 : i32
    %c0_i32_1 = arith.constant 0 : i32
    return %arg0, %c0_i32, %c0_i32_0 : i32, i32, i32
  }
  func.func @transform_5(%arg0: i32, %arg1: memref<2xi32, #tpu.memory_space<smem>>) -> (i32, i32, i32, i32) {
    %c0_i32 = arith.constant 0 : i32
    %c0_i32_0 = arith.constant 0 : i32
    %c0_i32_1 = arith.constant 0 : i32
    %c0_i32_2 = arith.constant 0 : i32
    return %arg0, %c0_i32, %c0_i32_0, %c0_i32_1 : i32, i32, i32, i32
  }
  func.func @transform_6(%arg0: i32, %arg1: memref<2xi32, #tpu.memory_space<smem>>) -> (i32, i32, i32) {
    %c0_i32 = arith.constant 0 : i32
    %c0_i32_0 = arith.constant 0 : i32
    %c0_i32_1 = arith.constant 0 : i32
    return %arg0, %c0_i32, %c0_i32_0 : i32, i32, i32
  }
  func.func @transform_7(%arg0: i32, %arg1: memref<2xi32, #tpu.memory_space<smem>>) -> (i32, i32, i32) {
    %c0_i32 = arith.constant 0 : i32
    %c0_i32_0 = arith.constant 0 : i32
    %c0_i32_1 = arith.constant 0 : i32
    return %arg0, %c0_i32, %c0_i32_0 : i32, i32, i32
  }
  func.func @transform_8(%arg0: i32, %arg1: memref<2xi32, #tpu.memory_space<smem>>) -> (i32, i32, i32) {
    %c0_i32 = arith.constant 0 : i32
    %c0_i32_0 = arith.constant 0 : i32
    %c0_i32_1 = arith.constant 0 : i32
    return %arg0, %c0_i32, %c0_i32_0 : i32, i32, i32
  }
  func.func @transform_9(%arg0: i32, %arg1: memref<2xi32, #tpu.memory_space<smem>>) -> (i32, i32, i32) {
    %c0_i32 = arith.constant 0 : i32
    %c0_i32_0 = arith.constant 0 : i32
    %c0_i32_1 = arith.constant 0 : i32
    return %arg0, %c0_i32, %c0_i32_0 : i32, i32, i32
  }
  func.func @transform_10(%arg0: i32, %arg1: memref<2xi32, #tpu.memory_space<smem>>) -> (i32, i32, i32) {
    %c0_i32 = arith.constant 0 : i32
    %c0_i32_0 = arith.constant 0 : i32
    %c0_i32_1 = arith.constant 0 : i32
    return %arg0, %c0_i32, %c0_i32_0 : i32, i32, i32
  }
  func.func @transform_11(%arg0: i32, %arg1: memref<2xi32, #tpu.memory_space<smem>>) -> (i32, i32, i32) {
    %c0_i32 = arith.constant 0 : i32
    %c0_i32_0 = arith.constant 0 : i32
    %c0_i32_1 = arith.constant 0 : i32
    return %arg0, %c0_i32, %c0_i32_0 : i32, i32, i32
  }
  func.func @transform_12(%arg0: i32, %arg1: memref<2xi32, #tpu.memory_space<smem>>) -> (i32, i32, i32) {
    %c0_i32 = arith.constant 0 : i32
    %c0_i32_0 = arith.constant 0 : i32
    %c0_i32_1 = arith.constant 0 : i32
    return %arg0, %c0_i32, %c0_i32_0 : i32, i32, i32
  }
  func.func @transform_13(%arg0: i32, %arg1: memref<2xi32, #tpu.memory_space<smem>>) -> (i32, i32, i32) {
    %c0_i32 = arith.constant 0 : i32
    %c0_i32_0 = arith.constant 0 : i32
    %c0_i32_1 = arith.constant 0 : i32
    return %arg0, %c0_i32, %c0_i32_0 : i32, i32, i32
  }
  func.func @transform_14(%arg0: i32, %arg1: memref<2xi32, #tpu.memory_space<smem>>) -> (i32, i32, i32) {
    %c0_i32 = arith.constant 0 : i32
    %c0_i32_0 = arith.constant 0 : i32
    %c0_i32_1 = arith.constant 0 : i32
    return %arg0, %c0_i32, %c0_i32_0 : i32, i32, i32
  }
  func.func @transform_15(%arg0: i32, %arg1: memref<2xi32, #tpu.memory_space<smem>>) -> (i32, i32) {
    %c0_i32 = arith.constant 0 : i32
    %c0_i32_0 = arith.constant 0 : i32
    %c0_i32_1 = arith.constant 0 : i32
    return %c0_i32, %c0_i32_0 : i32, i32
  }
  func.func @transform_16(%arg0: i32, %arg1: memref<2xi32, #tpu.memory_space<smem>>) -> (i32, i32) {
    %c0_i32 = arith.constant 0 : i32
    %c0_i32_0 = arith.constant 0 : i32
    %c0_i32_1 = arith.constant 0 : i32
    return %c0_i32, %c0_i32_0 : i32, i32
  }
  func.func @transform_17(%arg0: i32, %arg1: memref<2xi32, #tpu.memory_space<smem>>) -> (i32, i32) {
    %c0_i32 = arith.constant 0 : i32
    %c0_i32_0 = arith.constant 0 : i32
    %c0_i32_1 = arith.constant 0 : i32
    return %c0_i32, %c0_i32_0 : i32, i32
  }
  func.func @transform_18(%arg0: i32, %arg1: memref<2xi32, #tpu.memory_space<smem>>) -> (i32, i32) {
    %c0_i32 = arith.constant 0 : i32
    %c0_i32_0 = arith.constant 0 : i32
    %c0_i32_1 = arith.constant 0 : i32
    return %c0_i32, %c0_i32_0 : i32, i32
  }
  func.func @transform_19(%arg0: i32, %arg1: memref<2xi32, #tpu.memory_space<smem>>) -> (i32, i32) {
    %c0_i32 = arith.constant 0 : i32
    %c0_i32_0 = arith.constant 0 : i32
    %c0_i32_1 = arith.constant 0 : i32
    return %c0_i32, %c0_i32_0 : i32, i32
  }
  func.func @transform_20(%arg0: i32, %arg1: memref<2xi32, #tpu.memory_space<smem>>) -> (i32, i32) {
    %c0_i32 = arith.constant 0 : i32
    %c0_i32_0 = arith.constant 0 : i32
    %c0_i32_1 = arith.constant 0 : i32
    return %c0_i32, %c0_i32_0 : i32, i32
  }
}

</mosaic_0001>

<bundles_post_ra>
// kernel: tpu_custom_call.1
= control target key start
LH: loop header
LB: loop body
LE: loop exit
PB: predicated region body
PF: predicated region fallthrough
CT: control target
= control target key end

     0   :  { %s2887_s27 = smov [#allocation4]   ;;  %s3565_s0 = inlined_call_operand.hbm [shape: s32[2], index: 0, kind: input, shape index: {}]   ;;  %s3566_s1 = inlined_call_operand.vmem [shape: f32[16,32], index: 1, kind: input, shape index: {}]   ;;  %s3567_s2 = inlined_call_operand.vmem [shape: f32[1,32], index: 2, kind: input, shape index: {}]   ;;  %s3568_s3 = inlined_call_operand.hbm [shape: f32[1,32], index: 3, kind: input, shape index: {}]   ;;  %s3569_s4 = inlined_call_operand.vmem [shape: bf16[2,32,96], index: 4, kind: input, shape index: {}]   ;;  %s3570_s5 = inlined_call_operand.vmem [shape: f32[2,1,96], index: 5, kind: input, shape index: {}]   ;;  %s3571_s6 = inlined_call_operand.vmem [shape: bf16[2,4,8,32], index: 6, kind: input, shape index: {}]   ;;  %s3572_s7 = inlined_call_operand.vmem [shape: f32[2,1,32], index: 7, kind: input, shape index: {}]   ;;  %s3573_s8 = inlined_call_operand.vmem [shape: f32[2,1,32], index: 8, kind: input, shape index: {}]   ;;  %s3574_s9 = inlined_call_operand.hbm [shape: f32[2,1,32], index: 9, kind: input, shape index: {}]   ;;  %s3575_s10 = inlined_call_operand.vmem [shape: bf16[2,32,64], index: 10, kind: input, shape index: {}]   ;;  %s3576_s11 = inlined_call_operand.vmem [shape: f32[2,1,64], index: 11, kind: input, shape index: {}]   ;;  %s3577_s12 = inlined_call_operand.vmem [shape: bf16[2,64,32], index: 12, kind: input, shape index: {}]   ;;  %s3578_s13 = inlined_call_operand.vmem [shape: f32[2,1,32], index: 13, kind: input, shape index: {}]   ;;  %s3579_s14 = inlined_call_operand.vmem [shape: f32[2,1,32], index: 14, kind: input, shape index: {}]   ;;  %s3580_s15 = inlined_call_operand.hbm [shape: f32[2,1,32], index: 15, kind: input, shape index: {}]   ;;  %s3581_s16 = inlined_call_operand.hbm [shape: bf16[32,32], index: 16, kind: input, shape index: {}]   ;;  %s3582_s17 = inlined_call_operand.vmem [shape: f32[1,32], index: 17, kind: input, shape index: {}]   ;;  %s3583_s18 = inlined_call_operand.vmem [shape: bf16[32,5], index: 18, kind: input, shape index: {}]   ;;  %s3584_s19 = inlined_call_operand.vmem [shape: f32[1,5], index: 19, kind: input, shape index: {}]   ;;  %s3585_s20 = inlined_call_operand.hbm [shape: f32[2,5], index: 20, kind: output, shape index: {0}]   ;;  %s3586_s21 = inlined_call_operand.hbm [shape: f32[1,1], index: 21, kind: output, shape index: {1}]  }
   0x1   :  { %3592 = sst [smem:[#allocation24_spill]] %s3565_s0 }
   0x2   :  { %3593 = sst [smem:[#allocation25_spill]] %s3566_s1 }
   0x3   :  { %3594 = sst [smem:[#allocation26_spill]] %s3567_s2 }
   0x4   :  { %3595 = sst [smem:[#allocation27_spill]] %s3568_s3 }
   0x5   :  { %3596 = sst [smem:[#allocation28_spill]] %s3569_s4 }
   0x6   :  { %3597 = sst [smem:[#allocation29_spill]] %s3570_s5 }
   0x7   :  { %3598 = sst [smem:[#allocation30_spill]] %s3571_s6 }
   0x8   :  { %3599 = sst [smem:[#allocation31_spill]] %s3574_s9 }
   0x9   :  { %3600 = sst [smem:[#allocation32_spill]] %s3577_s12 }
   0xa   :  { %3601 = sst [smem:[#allocation33_spill]] %s3579_s14 }
   0xb   :  { %3602 = sst [smem:[#allocation34_spill]] %s3580_s15 }
   0xc   :  { %3603 = sst [smem:[#allocation35_spill]] %s3581_s16 }
   0xd   :  { %3604 = sst [smem:[#allocation36_spill]] %s3582_s17 }
   0xe   :  { %3605 = sst [smem:[#allocation37_spill]] %s3583_s18 }
   0xf   :  { %3606 = sst [smem:[#allocation38_spill]] %s3584_s19 }
  0x10   :  { %3607 = sst [smem:[#allocation39_spill]] %s3585_s20 }
  0x11   :  { %3608 = sst [smem:[#allocation40_spill]] %s3586_s21 }
  0x12   :  { %s3609_s26 = sld [smem:[#allocation24_spill]] }
  0x18   :  { %s28_s14 = sshll.u32 %s3609_s26, 4  ;;  %s29_s14 = int_to_ptr.hbm [resolvable:$true] %s28_s14 }
  0x19   :  { %31 = dma.hbm_to_smem %s29_s14, 16, %s2887_s27, [#allocation3] }
  0x1a   :  { %2849 = dma.done.wait [#allocation3], 16 }
  0x1b   :  { %2850 = vsyncadd [#allocation3], 4294967280 }
  0x1c   :  { %34 = sfence }
  0x1d   :  { %35 = vsyncpa [#allocation6], 0 }
  0x1e   :  { %36 = vsyncpa [#allocation9], 0 }
  0x1f   :  { %38 = vsyncpa [#allocation9 + $0x1], 0 }
  0x20   :  { %39 = vsyncpa [#allocation12], 0 }
  0x21   :  { %40 = vsyncpa [#allocation7], 0 }
  0x22   :  { %41 = vsyncpa [#allocation15], 0  ;;  %s3014_s3 = smov 0   ;;  %s3016_s28 = smov 0  }
  0x23   :  { %s3018_s29 = smov 0   ;;  %s3020_s0 = smov 0  }
  0x24 LB: > { %s3035_s14 = sadd.s32 1, %s2885_s0   ;;  %s247_s4 = sadd.s32 1, %s2881_s29  ;;  %s2885_s0 = sphi %s3020_s0, %s3641_s0   ;;  %s2881_s29 = sphi %s3018_s29, %s3645_s29   ;;  %s2877_s28 = sphi %s3016_s28, %s3644_s28   ;;  %s2873_s3 = sphi %s3014_s3, %s3643_s3  }
  0x25   : > { %3610 = sst [smem:[#allocation22_spill]] %s3035_s14  ;;  %s244_s30 = ssub.s32 %s2885_s0, %s3035_s14 }
  0x26   : > { %p254_p0 = scmp.ne.s32.totalorder %s2881_s29, %s2877_s28  ;;  %p245_p1 = scmp.eq.s32.totalorder %s244_s30, 0 }
  0x27   : > { %p255_p2 = scmp.eq.s32.totalorder %s2885_s0, 0  ;;  %p2516_p3 = scmp.lt.s32.totalorder %s2885_s0, 2 }
  0x28   : > { %s3045_s5 = scalar_select %p245_p1, %s2881_s29, %s247_s4  }
  0x29   : > { %p256_p4 = por %p255_p2, %p254_p0  ;;  %s641_s22 = sand.u32 1, %s2885_s0  }
  0x2a   : > { %3611 = sst [smem:[#allocation23_spill]] %s3045_s5  ;;  %s3590_s23 = sand.u32 1, %s2881_s29  }
  0x2b   : > { %s3612_s9 = sld [smem:[#allocation31_spill]]  ;;  %s644_s26 = scalar_lea.vmem [#allocation8], %s3590_s23 }
  0x2c   : > { %s651_s27 = sshll.u32 %s644_s26, 4  ;;  %p3055_p5 = pnand %p2516_p3, %p256_p4  ;;  %s652_s27 = int_to_ptr.vmem [resolvable:$true] %s651_s27 }
  0x2d   : > { %s3060_s4 = sadd.s32 4294967295, %s2885_s0   ;;  %s3062_s30 = scalar_lea.sflag [#allocation9], %s641_s22 }
  0x2e   : > { %p2661_p7 = pneg %p3055_p5 }
  0x31   : > { %s647_s2 = scalar_lea.hbm %s3612_s9, %s2885_s0  ;;  %s2664_s26 = scalar_lea.hbm %s3612_s9, 2 }
  0x32   : > { %s649_s25 = sshll.u32 %s647_s2, 4  ;;  %s650_s25 = int_to_ptr.hbm [resolvable:$true] %s649_s25 }
  0x33   : > { %s2657_s5 = sshra.s32 %s650_s25, 4  ;;  %s2658_s5 = int_to_ptr.hbm [resolvable:$true] %s2657_s5 }
  0x34   : > { %s2659_s1 = scalar_lea.hbm %s2658_s5, 1  ;;  %p2665_p10 = scmp.lt.s32.totalorder %s2658_s5, %s3612_s9 }
  0x35   : > { %p2660_p6 = scmp.ne.s32.totalorder %s2658_s5, %s2659_s1  ;;  %p2666_p11 = scmp.lt.s32.totalorder %s2664_s26, %s2659_s1 }
  0x37   : > { %p2662_p8 = pnand %p2661_p7, %p2660_p6  ;;  %p2667_p12 = por %p2666_p11, %p2665_p10 }
  0x39   : > { %p2663_p9 = pneg %p2662_p8 }
  0x3b   : > { %p2668_p13 = pnand %p2667_p12, %p2663_p9 }
  0x3d   : > { %2671 = shalt.err (!%p2668_p13)
}
  0x3e   : > { %2510 = dma.hbm_to_vmem [thread:$0]  (!%p3055_p5), %s650_s25, 16, %s652_s27, %s3062_s30  }
  0x3f   : > { %p260_p0 = scmp.ne.s32.totalorder %s2877_s28, %s2873_s3  ;;  %p261_p1 = scmp.eq.s32.totalorder %s3060_s4, 0 }
  0x40   : > { %p2363_p2 = scmp.ge.s32.totalorder %s2885_s0, 1  ;;  %p553_p3 = scmp.lt.s32.totalorder %s2885_s0, 3 }
  0x41   : > { %p3085_p4 = por %p261_p1, %p260_p0  ;;  %p2364_p6 = scmp.ne.s32.totalorder %s3060_s4, 0 }
  0x42   : > { %p3090_p8 = pnand %p2363_p2, %p553_p3  ;;  %s3616_s1 = sld [smem:[#allocation27_spill]] }
  0x43   : > { %s2888_s3 = smov [#allocation5]   ;;  %s3617_s16 = sld [smem:[#allocation35_spill]] }
  0x44   : > { %p2500_p9 = pneg %p3090_p8  ;;  %s573_s25 = sshll.u32 %s2888_s3, 4  ;;  %s574_s25 = int_to_ptr.vmem [resolvable:$true] %s573_s25 }
  0x45   : > { %s2889_s9 = smov [#allocation11]   ;;  %s2890_s22 = smov 64  }
  0x46   : > { %p2501_p10 = pnand %p2500_p9, %p261_p1  ;;  %s584_s20 = sshll.u32 %s2889_s9, 4  ;;  %s585_s20 = int_to_ptr.vmem [resolvable:$true] %s584_s20 }
  0x47   : > { %s2891_s23 = smov 4   ;;  %s3618_s15 = sld [smem:[#allocation34_spill]] }
  0x48   : > { %s571_s24 = sshll.u32 %s3616_s1, 4  ;;  %s3619_s17 = sand.u32 1, %s2881_s29   ;;  %s572_s24 = int_to_ptr.hbm [resolvable:$true] %s571_s24 }
  0x49   : > { %s582_s26 = sshll.u32 %s3617_s16, 4  ;;  %s695_s18 = scalar_lea.vmem [#allocation10], %s3619_s17  ;;  %s583_s26 = int_to_ptr.hbm [resolvable:$true] %s582_s26 }
  0x4a   : > { %2503 = dma.hbm_to_vmem [thread:$0]  (!%p2501_p10), %s572_s24, 16, %s574_s25, [#allocation6]  }
  0x4b   : > { %2506 = dma.hbm_to_vmem [thread:$0]  (!%p2501_p10), %s583_s26, 256, %s585_s20, [#allocation12], %s2890_s22, %s2890_s22, %s2891_s23  }
  0x4c   : > { %s702_s12 = sshll.u32 %s695_s18, 4  ;;  %s703_s12 = int_to_ptr.vmem [resolvable:$true] %s702_s12 }
  0x4d   : > { %s698_s3 = scalar_lea.hbm %s3618_s15, %s2885_s0  ;;  %s2754_s24 = scalar_lea.hbm %s3618_s15, 2 }
  0x4e   : > { %s700_s27 = sshll.u32 %s698_s3, 4  ;;  %s701_s27 = int_to_ptr.hbm [resolvable:$true] %s700_s27 }
  0x4f   : > { %s2747_s2 = sshra.s32 %s701_s27, 4  ;;  %s2748_s2 = int_to_ptr.hbm [resolvable:$true] %s2747_s2 }
  0x50   : > { %s2749_s16 = scalar_lea.hbm %s2748_s2, 1  ;;  %p2755_p0 = scmp.lt.s32.totalorder %s2748_s2, %s3618_s15 }
  0x51   : > { %p2750_p11 = scmp.ne.s32.totalorder %s2748_s2, %s2749_s16  ;;  %p2756_p2 = scmp.lt.s32.totalorder %s2754_s24, %s2749_s16 }
  0x53   : > { %p2752_p12 = pnand %p2750_p11, %p2661_p7  ;;  %p2757_p3 = por %p2756_p2, %p2755_p0 }
  0x55   : > { %p2753_p13 = pneg %p2752_p12 }
  0x57   : > { %p2758_p9 = pnand %p2757_p3, %p2753_p13 }
  0x59   : > { %2761 = shalt.err (!%p2758_p9)
}
  0x5a   : > { %2513 = dma.hbm_to_vmem [thread:$0]  (!%p3055_p5), %s701_s27, 16, %s703_s12, %s3062_s30  }
  0x5b   : > { %711 = sbr.rel (%p3090_p8) target bundleno = 3419 (0xd5b), region = 96 }
  0x60   : > { %2852 = dma.done.wait (%p261_p1), [#allocation6], 16  }
  0x61   : > { %2854 = vsyncadd (%p261_p1), [#allocation6], 4294967280  ;;  %s718_s16 = sand.u32 1, %s3060_s4   ;;  %s720_s17 = sand.u32 1, %s2877_s28  }
  0x62   : > { %s719_s18 = scalar_lea.sflag [#allocation9], %s718_s16  ;;  %s3130_s25 = scalar_lea.vmem [#allocation8], %s720_s17 }
  0x63   : > { %2856 = dma.done.wait (%p3085_p4), %s719_s18, 32  }
  0x64   : > { %2858 = vsyncadd (%p3085_p4), %s719_s18, 4294967264  ;;  %s3136_s12 = scalar_lea.vmem [#allocation10], %s720_s17 }
  0x65   : > { %2860 = dma.done.wait (%p261_p1), [#allocation12], 256  }
  0x66   : > { %2862 = vsyncadd (%p261_p1), [#allocation12], 4294967040  ;;  %p829_p5 = scmp.lt.s32.totalorder %s3060_s4, 1  ;;  %s3621_s3 = sld [smem:[#allocation28_spill]] }
  0x67   : > { %s3622_s6 = sld [smem:[#allocation30_spill]] }
  0x68   : > { %s3144_s14 = scalar_select %p829_p5, %s3060_s4, 1 }
  0x69   : > { %s3623_s0 = sld [smem:[#allocation32_spill]] }
  0x6a   : > { %s2464_s30 = sshll.u32 %s3144_s14, 4  ;;  %s2467_s2 = sshll.u32 %s3144_s14, 5 }
  0x6b   : > { %s3172_s26 = scalar_lea.vmem %s3575_s10, %s2464_s30  ;;  %s3624_s18 = sld [smem:[#allocation33_spill]] }
  0x6c   : > { %s3154_s27 = scalar_lea.vmem %s3621_s3, %s2464_s30  ;;  %s855_s3 = scalar_lea.vmem %s3576_s11, %s3144_s14 }
  0x6d   : > { %s3159_s20 = scalar_lea.vmem %s3622_s6, %s2464_s30  ;;  %s863_s6 = scalar_lea.vmem %s3578_s13, %s3144_s14 }
  0x6e   : > { %871 = sbr.rel (%p2364_p6) target bundleno = 394 (0x18a), region = 116  ;;  %s3625_s23 = sld [smem:[#allocation25_spill]] (!%p2364_p6) }
  0x6f   : > { %s3186_s15 = scalar_lea.vmem %s3623_s0, %s2467_s2  ;;  %s3626_s2 = sld [smem:[#allocation26_spill]] (!%p2364_p6) }
  0x71   : > { %s866_s21 = scalar_lea.vmem %s3624_s18, %s3144_s14 }
  0x73   : > { %vm876_vm0 = vcmask 261120   ;;  %v2892_v4 = vmov 32.0   ;;  %v2570_v38 = vld [vmem:[#allocation5] ss:$0 sm:$0xff] }
  0x74   : > { %v872_v0 = vld [vmem:[%s3625_s23] sm:$0xff]  ;;  %v873_v2 = vld [vmem:[%s3625_s23 + $0x8] sm:$0xff]  ;;  %2571 = vrcp.f32 %v2892_v4 }
  0x75   : > { %v877_v1 = vsel %vm876_vm0, %v872_v0, 0.0  ;;  %v880_v3 = vsel %vm876_vm0, %v873_v2, 0.0  ;;  %v2569_v35 = vld [vmem:[%s3626_s2] ss:$0 sm:$0xff] }
  0x76   : > { %878 = vadd.xlane.f32.xlu0 %v877_v1 }
  0x7a   : > { %v2572_v5 = vpop.eup %2571 }
  0x7b   : > { %v884_v6 = vmul.f32 32.0, %v2572_v5  ;;  %vm888_vm1 = vweird.f32 %v2572_v5 }
  0x7d   : > { %v885_v7 = vsub.f32 1.0, %v884_v6 }
  0x7e   : > { %881 = vadd.xlane.f32.xlu0 %v880_v3 }
  0x7f   : > { %v886_v8 = vmul.f32 %v2572_v5, %v885_v7 }
  0x81   : > { %v887_v9 = vadd.f32 %v2572_v5, %v886_v8 }
  0x83   : > { %v889_v10 = vsel %vm888_vm1, %v2572_v5, %v887_v9 }
  0xe9   : > { %v879_v11 = vpop.xlane.xlu0 %878 }
  0xea   : > { %v890_v12 = vmul.f32 %v889_v10, %v879_v11 }
  0xec   : > { %v892_v13 = vsub.f32 %v872_v0, %v890_v12 }
  0xee   : > { %v894_v14 = vmul.f32 %v892_v13, %v892_v13 }
  0xf0   : > { %v896_v15 = vsel %vm876_vm0, %v894_v14, 0.0 }
  0xf1   : > { %897 = vadd.xlane.f32.xlu1 %v896_v15  ;;  %v882_v16 = vpop.xlane.xlu0 %881 }
  0xf2   : > { %v891_v17 = vmul.f32 %v889_v10, %v882_v16 }
  0xf4   : > { %v893_v18 = vsub.f32 %v873_v2, %v891_v17 }
  0xf6   : > { %v895_v19 = vmul.f32 %v893_v18, %v893_v18 }
  0xf8   : > { %v899_v20 = vsel %vm876_vm0, %v895_v19, 0.0 }
  0xf9   : > { %900 = vadd.xlane.f32.xlu1 %v899_v20 }
 0x164   : > { %v898_v21 = vpop.xlane.xlu1 %897 }
 0x165   : > { %v902_v22 = vmul.f32 %v898_v21, %v889_v10 }
 0x167   : > { %v904_v23 = vadd.f32 1e-12, %v902_v22 }
 0x169   : > { %2573 = vrsqrt.f32 %v904_v23  ;;  %vm912_vm3 = vweird.f32 %v904_v23 }
 0x16c   : > { %v901_v24 = vpop.xlane.xlu1 %900 }
 0x16d   : > { %v903_v25 = vmul.f32 %v901_v24, %v889_v10 }
 0x16f   : > { %v2574_v26 = vpop.eup %2573  ;;  %v905_v27 = vadd.f32 1e-12, %v903_v25 }
 0x170   : > { %v907_v28 = vmul.f32 %v2574_v26, %v904_v23  ;;  %vm913_vm2 = vweird.f32 %v2574_v26 }
 0x171   : > { %2575 = vrsqrt.f32 %v905_v27  ;;  %vm914_vm4 = vmor %vm912_vm3, %vm913_vm2  ;;  %vm922_vm6 = vweird.f32 %v905_v27 }
 0x172   : > { %v908_v29 = vmul.f32 %v2574_v26, %v907_v28 }
 0x174   : > { %v909_v30 = vmul.f32 0.5, %v908_v29 }
 0x176   : > { %v910_v31 = vsub.f32 1.5, %v909_v30 }
 0x177   : > { %v2576_v32 = vpop.eup %2575 }
 0x178   : > { %v911_v33 = vmul.f32 %v2574_v26, %v910_v31  ;;  %v917_v34 = vmul.f32 %v2576_v32, %v905_v27  ;;  %vm923_vm5 = vweird.f32 %v2576_v32 }
 0x179   : > { %vm924_vm7 = vmor %vm922_vm6, %vm923_vm5 }
 0x17a   : > { %v915_v36 = vsel %vm914_vm4, %v2574_v26, %v911_v33  ;;  %v918_v37 = vmul.f32 %v2576_v32, %v917_v34 }
 0x17b   : > { %v926_v39 = vmul.f32 %v915_v36, %v892_v13 }
 0x17c   : > { %v919_v40 = vmul.f32 0.5, %v918_v37 }
 0x17d   : > { %v931_v41 = vmul.f32 %v2569_v35, %v926_v39 }
 0x17e   : > { %v920_v42 = vsub.f32 1.5, %v919_v40 }
 0x17f   : > { %v936_v43 = vadd.f32 %v2570_v38, %v931_v41 }
 0x180   : > { %v921_v44 = vmul.f32 %v2576_v32, %v920_v42 }
 0x181   : > { %938 = vst.msk [vmem:[#allocation2] sm:$0xff] %vm876_vm0, %v936_v43 }
 0x182   : > { %v925_v45 = vsel %vm924_vm7, %v2576_v32, %v921_v44 }
 0x183   : > { %v927_v46 = vmul.f32 %v925_v45, %v893_v18 }
 0x185   : > { %v932_v47 = vmul.f32 %v2569_v35, %v927_v46 }
 0x187   : > { %v937_v48 = vadd.f32 %v2570_v38, %v932_v47 }
 0x189   : > { %939 = vst.msk [vmem:[#allocation2 + $0x8] sm:$0xff] %vm876_vm0, %v937_v48 }
 0x18a PF: > { %v2469_v49 = vld [vmem:[%s3154_s27 + $0x8] sm:$0xff]  ;;  %v2468_v50 = vld [vmem:[%s3154_s27] sm:$0xff]  ;;  %vm986_vm8 = vcmask 261120   ;;  %s3627_s19 = sld [smem:[#allocation29_spill]]  ;;  %s2893_s27 = smov 104   ;;  %vm1023_vm9 = vcmask 64512  }
 0x18b   : > { %v3211_v51 = vld [vmem:[#allocation2] sm:$0xff]  ;;  %996 = vmatpush.bf16.msra.mxu0 %v2469_v49  ;;  %s2894_s17 = smov 120   ;;  %s2895_s30 = smov 112   ;;  %vm1220_vm10 = vcmask 1043456  }
 0x18c   : > { %s2896_s5 = smov 96   ;;  %s2897_s22 = smov 64  }
 0x18d   : > { %s3631_s0 = scalar_lea.vmem %s3572_s7, %s3144_s14  ;;  %s3634_s2 = scalar_lea.vmem %s3573_s8, %s3144_s14 }
 0x18e   : > { %p2438_p7 = scmp.ne.s32.totalorder %s3060_s4, 1 }
 0x18f   : > { %997 = vmatpush.bf16.msra.mxu0 %v2468_v50 }
 0x190   : > { %v3213_v52 = vld [vmem:[#allocation2 + $0x8] sm:$0xff]  ;;  %s3628_s16 = scalar_lea.vmem %s3627_s19, %s3144_s14 }
 0x191   : > { %v970_v53 = vpack.c.bf16 %v3213_v52, %v3211_v51  ;;  %v3223_v54 = vld [vmem:[%s3628_s16] ss:$0 sm:$0xff] }
 0x193   : > { %2387 = vmatmul.msk.bf16.vlgmr.msra.gmra.mxu0 %vm986_vm8, %v970_v53 }
 0x210   : > { %v999_v55 = vpop.f32.mrf.mxu0 }
 0x211   : > { %v1000_v56 = vadd.f32 %v3223_v54, %v999_v55 }
 0x213   : > { %1011 = vrot.lane.b32.xlu1 %v1000_v56, %s2893_s27  ;;  %1005 = vrot.lane.b32.xlu0 %v1000_v56, %s2894_s17  ;;  %v1014_v5 = vpack.c.bf16 %v1000_v56, %v1000_v56 }
 0x215   : > { %v1019_v6 = vunpack.c.l.b16 %v1014_v5 }
 0x217   : > { %v1020_v7 = vpack.c.b16 %v1019_v6, %v1019_v6 }
 0x218   : > { %v1001_v18 = vpop.f32.mrf.mxu0 }
 0x219   : > { %v3254_v29 = vadd.f32 %v3223_v54, %v1001_v18 }
 0x21b   : > { %1008 = vrot.lane.b32.xlu0 %v1000_v56, %s2895_s30 }
 0x285   : > { %v1012_v57 = vpop.permute.xlu1 %1011  ;;  %v1006_v58 = vpop.permute.xlu0 %1005 }
 0x286   : > { %v1017_v59 = vpack.c.bf16 %v1012_v57, %v1012_v57  ;;  %v1015_v60 = vpack.c.bf16 %v1006_v58, %v1006_v58 }
 0x288   : > { %v1092_v61 = vunpack.c.l.b16 %v1017_v59  ;;  %v1044_v62 = vunpack.c.l.b16 %v1015_v60 }
 0x28a   : > { %v3229_v63 = vpack.c.b16 %v1092_v61, %v1092_v61  ;;  %v1045_v0 = vpack.c.b16 %v1044_v62, %v1044_v62 }
 0x28c   : > { %1094 = vrot.lane.b32.xlu0 %v3229_v63, %s2896_s5  ;;  %1046 = vrot.lane.b32.xlu1 %v1045_v0, %s2896_s5 }
 0x28d   : > { %v1009_v1 = vpop.permute.xlu0 %1008 }
 0x28e   : > { %v1016_v2 = vpack.c.bf16 %v1009_v1, %v1009_v1 }
 0x290   : > { %v1068_v3 = vunpack.c.l.b16 %v1016_v2 }
 0x292   : > { %v3234_v4 = vpack.c.b16 %v1068_v3, %v1068_v3 }
 0x294   : > { %1070 = vrot.lane.b32.xlu2 %v3234_v4, %s2896_s5 }
 0x29c   : > { %1021 = vrot.lane.b32.xlu2 %v1020_v7, %s2896_s5 }
 0x2ee   : > { %v1071_v8 = vpop.permute.xlu2 %1070 }
 0x2ef   : > { %v1076_v9 = vsel %vm1023_vm9, %v1071_v8, 0 }
 0x2f0   : > { %1085 = vmatpush.bf16.xpose.msra.mxu3 %v1076_v9 }
 0x2f6   : > { %v1022_v10 = vpop.permute.xlu2 %1021 }
 0x2f7   : > { %2390 = vmatmul.msk.bf16.vlgmr.msra.gmra.mxu3 %vm1023_vm9, %v1016_v2  ;;  %v1028_v11 = vsel %vm1023_vm9, %v1022_v10, 0 }
 0x2f8   : > { %1037 = vmatpush.bf16.xpose.msra.mxu1 %v1028_v11 }
 0x2fe   : > { %v1047_v12 = vpop.permute.xlu1 %1046  ;;  %v1095_v13 = vpop.permute.xlu0 %1094 }
 0x2ff   : > { %2388 = vmatmul.msk.bf16.vlgmr.msra.gmra.mxu1 %vm1023_vm9, %v1014_v5  ;;  %v1052_v14 = vsel %vm1023_vm9, %v1047_v12, 0  ;;  %v1100_v15 = vsel %vm1023_vm9, %v1095_v13, 0 }
 0x300   : > { %1061 = vmatpush.bf16.xpose.msra.mxu2 %v1052_v14  ;;  %1109 = vmatpush.bf16.xpose.msrb.mxu0 %v1100_v15 }
 0x307   : > { %2389 = vmatmul.msk.bf16.vlgmr.msra.gmra.mxu2 %vm1023_vm9, %v1015_v60  ;;  %2391 = vmatmul.msk.bf16.vlgmr.msrb.gmra.mxu0 %vm1023_vm9, %v1017_v59 }
 0x37a   : > { %v1087_v16 = vpop.f32.mrf.mxu3 }
 0x37b   : > { %v1121_v17 = vsel %vm1023_vm9, %v1087_v16, -inf }
 0x37c   : > { %1122 = vmax.xlane.f32.xlu2 %v1121_v17  ;;  %v1039_v19 = vpop.f32.mrf.mxu1 }
 0x37d   : > { %v1115_v20 = vsel %vm1023_vm9, %v1039_v19, -inf }
 0x37e   : > { %1116 = vmax.xlane.f32.xlu0 %v1115_v20 }
 0x382   : > { %v1089_v21 = vpop.f32.mrf.mxu3 }
 0x384   : > { %v1041_v22 = vpop.f32.mrf.mxu1  ;;  %v1111_v23 = vpop.f32.mrf.mxu0 }
 0x385   : > { %v1124_v24 = vsel %vm1023_vm9, %v1111_v23, -inf }
 0x386   : > { %1125 = vmax.xlane.f32.xlu2 %v1124_v24 }
 0x38a   : > { %v1063_v25 = vpop.f32.mrf.mxu2 }
 0x38b   : > { %v1118_v26 = vsel %vm1023_vm9, %v1063_v25, -inf }
 0x38c   : > { %1119 = vmax.xlane.f32.xlu1 %v1118_v26  ;;  %v1113_v27 = vpop.f32.mrf.mxu0 }
 0x392   : > { %v1065_v28 = vpop.f32.mrf.mxu2  ;;  %1237 = vrot.lane.b32.xlu0 %v1045_v0, %s2897_s22 }
 0x39a   : > { %1215 = vrot.lane.b32.xlu0 %v1020_v7, %s2897_s22 }
 0x3a2   : > { %1391 = vrot.lane.b32.xlu0 %v3254_v29, %s2895_s30 }
 0x3ef   : > { %v1123_v30 = vpop.xlane.xlu2 %1122 }
 0x3f0   : > { %v1129_v33 = vsub.f32 %v1087_v16, %v1123_v30 }
 0x3f1   : > { %v1117_v31 = vpop.xlane.xlu0 %1116 }
 0x3f2   : > { %v1127_v32 = vsub.f32 %v1039_v19, %v1117_v31  ;;  %v1135_v35 = vmul.f32 1.442695, %v1129_v33 }
 0x3f4   : > { %v1131_v34 = vmul.f32 1.442695, %v1127_v32 }
 0x3f6   : > { %2585 = vpow2.f32 %v1131_v34 }
 0x3f7   : > { %2587 = vpow2.f32 %v1135_v35 }
 0x3f9   : > { %v1126_v36 = vpop.xlane.xlu2 %1125 }
 0x3fa   : > { %v1130_v37 = vsub.f32 %v1111_v23, %v1126_v36 }
 0x3fc   : > { %v2586_v38 = vpop.eup %2585  ;;  %v1137_v40 = vmul.f32 1.442695, %v1130_v37 }
 0x3fd   : > { %v1139_v39 = vsel %vm1023_vm9, %v2586_v38, 0.0  ;;  %v3259_v43 = vpop.eup %2587 }
 0x3fe   : > { %1140 = vadd.xlane.f32.xlu2 %v1139_v39  ;;  %2589 = vpow2.f32 %v1137_v40  ;;  %v1145_v47 = vsel %vm1023_vm9, %v3259_v43, 0.0 }
 0x3ff   : > { %v1120_v41 = vpop.xlane.xlu1 %1119 }
 0x400   : > { %v1128_v42 = vsub.f32 %v1063_v25, %v1120_v41 }
 0x402   : > { %v1133_v44 = vmul.f32 1.442695, %v1128_v42 }
 0x404   : > { %2591 = vpow2.f32 %v1133_v44  ;;  %v1238_v45 = vpop.permute.xlu0 %1237  ;;  %v3264_v48 = vpop.eup %2589 }
 0x405   : > { %v1243_v46 = vsel %vm1220_vm10, %v1238_v45, 0  ;;  %v1148_v55 = vsel %vm1023_vm9, %v3264_v48, 0.0 }
 0x406   : > { %1252 = vmatpush.bf16.msrb.mxu2 %v1243_v46  ;;  %1146 = vadd.xlane.f32.xlu2 %v1145_v47 }
 0x40a   : > { %v3266_v49 = vpop.eup %2591 }
 0x40b   : > { %v1142_v50 = vsel %vm1023_vm9, %v3266_v49, 0.0 }
 0x40c   : > { %1143 = vadd.xlane.f32.xlu1 %v1142_v50  ;;  %v1216_v53 = vpop.permute.xlu0 %1215 }
 0x40d   : > { %v1222_v54 = vsel %vm1220_vm10, %v1216_v53, 0 }
 0x40e   : > { %1231 = vmatpush.bf16.msrb.mxu1 %v1222_v54  ;;  %1149 = vadd.xlane.f32.xlu2 %v1148_v55  ;;  %v949_v54 = vld [vmem:[%s3159_s20 + $0x8] sm:$0xf] }
 0x414   : > { %v1392_v56 = vpop.permute.xlu0 %1391 }
 0x415   : > { %v3279_v57 = vpack.c.bf16 %v1392_v56, %v1392_v56 }
 0x417   : > { %v1450_v58 = vunpack.c.l.b16 %v3279_v57 }
 0x419   : > { %v3284_v59 = vpack.c.b16 %v1450_v58, %v1450_v58 }
 0x425   : > { %1258 = vrot.lane.b32.xlu1 %v3234_v4, %s2897_s22 }
 0x426   : > { %1279 = vrot.lane.b32.xlu2 %v3229_v63, %s2897_s22 }
 0x42d   : > { %1388 = vrot.lane.b32.xlu1 %v3254_v29, %s2894_s17 }
 0x435   : > { %1394 = vrot.lane.b32.xlu1 %v3254_v29, %s2893_s27 }
 0x43d   : > { %1452 = vrot.lane.b32.xlu1 %v3284_v59, %s2896_s5 }
 0x471   : > { %v1141_v60 = vpop.xlane.xlu2 %1140 }
 0x472   : > { %2593 = vrcp.f32 %v1141_v60  ;;  %v1162_v2 = vand.u32 2147483648, %v1141_v60  ;;  %v1160_v3 = vand.u32 2147483647, %v1141_v60  ;;  %vm1156_vm12 = vweird.f32 %v1141_v60 }
 0x474   : > { %v1163_v7 = vor.u32 1.1754944e-38, %v1162_v2  ;;  %vm1161_vm14 = vcmp.eq.f32.partialorder %v1160_v3, 8.507059e+37 }
 0x478   : > { %v2594_v61 = vpop.eup %2593 }
 0x479   : > { %v1152_v62 = vmul.f32 %v2594_v61, %v1141_v60  ;;  %v3288_v63 = vpop.xlane.xlu2 %1146  ;;  %vm1157_vm11 = vweird.f32 %v2594_v61  ;;  %v3310_v60 = vsel %vm1220_vm10, %v949_v54, 0 }
 0x47a   : > { %2595 = vrcp.f32 %v3288_v63  ;;  %vm1158_vm13 = vmor %vm1156_vm12, %vm1157_vm11  ;;  %v1192_v22 = vand.u32 2147483648, %v3288_v63  ;;  %vm1186_vm3 = vweird.f32 %v3288_v63  ;;  %v1190_v34 = vand.u32 2147483647, %v3288_v63 }
 0x47b   : > { %v1153_v0 = vsub.f32 1.0, %v1152_v62 }
 0x47c   : > { %v1193_v42 = vor.u32 1.1754944e-38, %v1192_v22 }
 0x47d   : > { %v1154_v1 = vmul.f32 %v2594_v61, %v1153_v0 }
 0x47f   : > { %v1155_v4 = vadd.f32 %v2594_v61, %v1154_v1  ;;  %v1144_v5 = vpop.xlane.xlu1 %1143 }
 0x480   : > { %v2596_v6 = vpop.eup %2595  ;;  %2597 = vrcp.f32 %v1144_v5  ;;  %v1177_v23 = vand.u32 2147483648, %v1144_v5  ;;  %v1175_v26 = vand.u32 2147483647, %v1144_v5  ;;  %vm1171_vm1 = vweird.f32 %v1144_v5 }
 0x481   : > { %v1182_v8 = vmul.f32 %v2596_v6, %v3288_v63  ;;  %v1150_v9 = vpop.xlane.xlu2 %1149  ;;  %v1159_v10 = vsel %vm1158_vm13, %v2594_v61, %v1155_v4  ;;  %vm1187_vm0 = vweird.f32 %v2596_v6  ;;  %vm1191_vm13 = vcmp.eq.f32.partialorder %v1190_v34, 8.507059e+37 }
 0x482   : > { %2599 = vrcp.f32 %v1150_v9  ;;  %v1164_v11 = vsel %vm1161_vm14, %v1163_v7, %v1159_v10  ;;  %v1207_v30 = vand.u32 2147483648, %v1150_v9  ;;  %v1205_v33 = vand.u32 2147483647, %v1150_v9  ;;  %vm3297_vm5 = vmor %vm1186_vm3, %vm1187_vm0  ;;  %v950_v10 = vld [vmem:[%s3159_s20 + $0xc] sm:$0xf] }
 0x483   : > { %v1183_v12 = vsub.f32 1.0, %v1182_v8  ;;  %v1165_v13 = vmul.f32 %v2586_v38, %v1164_v11  ;;  %v1178_v35 = vor.u32 1.1754944e-38, %v1177_v23  ;;  %vm1176_vm6 = vcmp.eq.f32.partialorder %v1175_v26, 8.507059e+37  ;;  %v947_v8 = vld [vmem:[%s3159_s20] sm:$0xf] }
 0x484   : > { %vm1201_vm7 = vweird.f32 %v1150_v9  ;;  %v1208_v39 = vor.u32 1.1754944e-38, %v1207_v30  ;;  %vm1206_vm12 = vcmp.eq.f32.partialorder %v1205_v33, 8.507059e+37  ;;  %v3337_v11 = vsel %vm1220_vm10, %v950_v10, 0 }
 0x485   : > { %v1211_v15 = vpack.c.bf16 %v1165_v13, %v1165_v13  ;;  %v1184_v18 = vmul.f32 %v2596_v6, %v1183_v12  ;;  %v948_v12 = vld [vmem:[%s3159_s20 + $0x4] sm:$0xf]  ;;  %s3518_s20 = sld [smem:[#allocation4]] (!%p2438_p7) }
 0x486   : > { %v2598_v14 = vpop.eup %2597  ;;  %v3342_v13 = vsel %vm1220_vm10, %v948_v12, 0 }
 0x487   : > { %v1167_v16 = vmul.f32 %v2598_v14, %v1144_v5  ;;  %2392 = vmatmul.msk.bf16.vlgmr.msrb.gmra.mxu1 %vm1023_vm9, %v1211_v15  ;;  %vm1172_vm15 = vweird.f32 %v2598_v14  ;;  %v1185_v28 = vadd.f32 %v2596_v6, %v1184_v18  ;;  %1336 = vmatpush.bf16.msra.mxu2 %v3342_v13 }
 0x488   : > { %v2600_v17 = vpop.eup %2599  ;;  %vm1173_vm4 = vmor %vm1171_vm1, %vm1172_vm15 }
 0x489   : > { %v1168_v19 = vsub.f32 1.0, %v1167_v16  ;;  %v1197_v20 = vmul.f32 %v2600_v17, %v1150_v9  ;;  %v1280_v21 = vpop.permute.xlu2 %1279  ;;  %vm1202_vm2 = vweird.f32 %v2600_v17  ;;  %v1189_v41 = vsel %vm3297_vm5, %v2596_v6, %v1185_v28 }
 0x48a   : > { %v1285_v24 = vsel %vm1220_vm10, %v1280_v21, 0  ;;  %vm1203_vm11 = vmor %vm1201_vm7, %vm1202_vm2  ;;  %v1194_v53 = vsel %vm1191_vm13, %v1193_v42, %v1189_v41  ;;  %v3332_v9 = vsel %vm1220_vm10, %v947_v8, 0 }
 0x48b   : > { %v1169_v25 = vmul.f32 %v2598_v14, %v1168_v19  ;;  %v1198_v27 = vsub.f32 1.0, %v1197_v20  ;;  %1294 = vmatpush.bf16.msra.mxu0 %v1285_v24  ;;  %v1195_v56 = vmul.f32 %v3259_v43, %v1194_v53  ;;  %v1397_v43 = vpack.c.bf16 %v3254_v29, %v3254_v29  ;;  %1317 = vmatpush.bf16.msra.mxu1 %v3332_v9  ;;  %p2087_p4 = scmp.ne.s32.totalorder (!%p2438_p7), %s3518_s20, 4294967196 }
 0x48d   : > { %v1170_v31 = vadd.f32 %v2598_v14, %v1169_v25  ;;  %v1199_v32 = vmul.f32 %v2600_v17, %v1198_v27  ;;  %v1213_v61 = vpack.c.bf16 %v1195_v56, %v1195_v56  ;;  %v1402_v3 = vunpack.c.l.b16 %v1397_v43 }
 0x48f   : > { %v1200_v37 = vadd.f32 %v2600_v17, %v1199_v32  ;;  %v1174_v38 = vsel %vm1173_vm4, %v2598_v14, %v1170_v31  ;;  %v3323_v6 = vpack.c.b16 %v1402_v3, %v1402_v3  ;;  %1374 = vmatpush.bf16.msrb.mxu0 %v3337_v11 }
 0x490   : > { %v1179_v40 = vsel %vm1176_vm6, %v1178_v35, %v1174_v38 }
 0x491   : > { %v1204_v44 = vsel %vm1203_vm11, %v2600_v17, %v1200_v37  ;;  %v1180_v45 = vmul.f32 %v3266_v49, %v1179_v40 }
 0x492   : > { %v1209_v46 = vsel %vm1206_vm12, %v1208_v39, %v1204_v44 }
 0x493   : > { %v1210_v47 = vmul.f32 %v3264_v48, %v1209_v46  ;;  %v1212_v50 = vpack.c.bf16 %v1180_v45, %v1180_v45 }
 0x495   : > { %2393 = vmatmul.msk.bf16.vlgmr.msrb.gmra.mxu2 %vm1023_vm9, %v1212_v50  ;;  %v1214_v55 = vpack.c.bf16 %v1210_v47, %v1210_v47 }
 0x497   : > { %v1259_v58 = vpop.permute.xlu1 %1258  ;;  %2395 = vmatmul.msk.bf16.vlgmr.msra.gmra.mxu0 %vm1023_vm9, %v1214_v55 }
 0x498   : > { %v1264_v49 = vsel %vm1220_vm10, %v1259_v58, 0 }
 0x499   : > { %1273 = vmatpush.bf16.msrb.mxu3 %v1264_v49 }
 0x49c   : > { %2394 = vmatmul.msk.bf16.vlgmr.msrb.gmra.mxu3 %vm1023_vm9, %v1213_v61 }
 0x49d   : > { %1355 = vmatpush.bf16.msra.mxu3 %v3310_v60 }
 0x49f   : > { %v1389_v48 = vpop.permute.xlu1 %1388 }
 0x4a0   : > { %v1398_v62 = vpack.c.bf16 %v1389_v48, %v1389_v48 }
 0x4a2   : > { %v1426_v63 = vunpack.c.l.b16 %v1398_v62 }
 0x4a4   : > { %v3315_v0 = vpack.c.b16 %v1426_v63, %v1426_v63 }
 0x4a6   : > { %1428 = vrot.lane.b32.xlu0 %v3315_v0, %s2896_s5 }
 0x4a7   : > { %v1395_v1 = vpop.permute.xlu1 %1394 }
 0x4a8   : > { %v1400_v2 = vpack.c.bf16 %v1395_v1, %v1395_v1 }
 0x4aa   : > { %v1474_v4 = vunpack.c.l.b16 %v1400_v2 }
 0x4ac   : > { %v3321_v5 = vpack.c.b16 %v1474_v4, %v1474_v4 }
 0x4ae   : > { %1404 = vrot.lane.b32.xlu0 %v3323_v6, %s2896_s5  ;;  %1476 = vrot.lane.b32.xlu2 %v3321_v5, %s2896_s5  ;;  %s3637_s5 = sld [smem:[#allocation36_spill]] (!%p2438_p7) }
 0x4af   : > { %v1453_v29 = vpop.permute.xlu1 %1452 }
 0x4b0   : > { %v1458_v7 = vsel %vm1023_vm9, %v1453_v29, 0 }
 0x4b1   : > { %1467 = vmatpush.bf16.xpose.msrb.mxu3 %v1458_v7 }
 0x504   : > { %v1233_v14 = vpop.f32.mrf.mxu1 }
 0x505   : > { %v1300_v15 = vpack.c.bf16 %v1233_v14, %v1233_v14 }
 0x507   : > { %2396 = vmatmul.msk.bf16.vlgmr.msra.gmra.mxu1 %vm1023_vm9, %v1300_v15 }
 0x508   : > { %v1477_v16 = vpop.permute.xlu2 %1476 }
 0x509   : > { %v1482_v17 = vsel %vm1023_vm9, %v1477_v16, 0 }
 0x50a   : > { %1491 = vmatpush.bf16.xpose.msra.mxu0 %v1482_v17 }
 0x50c   : > { %v1235_v18 = vpop.f32.mrf.mxu1 }
 0x514   : > { %v1296_v19 = vpop.f32.mrf.mxu0 }
 0x515   : > { %v1303_v20 = vpack.c.bf16 %v1296_v19, %v1296_v19 }
 0x517   : > { %2399 = vmatmul.msk.bf16.vlgmr.msrb.gmra.mxu0 %vm1023_vm9, %v1303_v20 }
 0x518   : > { %v1254_v21 = vpop.f32.mrf.mxu2  ;;  %v1429_v22 = vpop.permute.xlu0 %1428 }
 0x519   : > { %v1301_v23 = vpack.c.bf16 %v1254_v21, %v1254_v21  ;;  %v1434_v24 = vsel %vm1023_vm9, %v1429_v22, 0 }
 0x51a   : > { %1443 = vmatpush.bf16.xpose.msrb.mxu2 %v1434_v24 }
 0x51b   : > { %2397 = vmatmul.msk.bf16.vlgmr.msra.gmra.mxu2 %vm1023_vm9, %v1301_v23 }
 0x51c   : > { %v1298_v25 = vpop.f32.mrf.mxu0 }
 0x51d   : > { %v3396_v25 = vld [vmem:[%s3631_s0] ss:$0 sm:$0xff] }
 0x51f   : > { %v1275_v26 = vpop.f32.mrf.mxu3 }
 0x520   : > { %v1302_v27 = vpack.c.bf16 %v1275_v26, %v1275_v26  ;;  %v1256_v28 = vpop.f32.mrf.mxu2  ;;  %v1405_v30 = vpop.permute.xlu0 %1404 }
 0x521   : > { %v1410_v31 = vsel %vm1023_vm9, %v1405_v30, 0 }
 0x522   : > { %2398 = vmatmul.msk.bf16.vlgmr.msra.gmra.mxu3 %vm1023_vm9, %v1302_v27  ;;  %1419 = vmatpush.bf16.xpose.msrb.mxu1 %v1410_v31 }
 0x527   : > { %v1277_v32 = vpop.f32.mrf.mxu3  ;;  %2403 = vmatmul.msk.bf16.vlgmr.msra.gmra.mxu0 %vm1023_vm9, %v1400_v2 }
 0x529   : > { %2400 = vmatmul.msk.bf16.vlgmr.msrb.gmra.mxu1 %vm1023_vm9, %v1397_v43 }
 0x52b   : > { %2401 = vmatmul.msk.bf16.vlgmr.msrb.gmra.mxu2 %vm1023_vm9, %v1398_v62 }
 0x532   : > { %2402 = vmatmul.msk.bf16.vlgmr.msrb.gmra.mxu3 %vm1023_vm9, %v3279_v57 }
 0x584   : > { %v1319_v33 = vpop.f32.mrf.mxu1 }
 0x585   : > { %v1380_v38 = vsel %vm986_vm8, %v1319_v33, 0.0 }
 0x58c   : > { %v1321_v34 = vpop.f32.mrf.mxu1 }
 0x594   : > { %v1376_v35 = vpop.f32.mrf.mxu0 }
 0x595   : > { %v1385_v57 = vsel %vm986_vm8, %v1376_v35, 0.0 }
 0x59c   : > { %v1378_v36 = vpop.f32.mrf.mxu0 }
 0x59e   : > { %v1338_v37 = vpop.f32.mrf.mxu2 }
 0x59f   : > { %v1381_v39 = vsel %vm986_vm8, %v1338_v37, 0.0 }
 0x5a0   : > { %v1382_v40 = vadd.f32 %v1381_v39, %v1380_v38 }
 0x5a4   : > { %v1493_v41 = vpop.f32.mrf.mxu0 }
 0x5a5   : > { %v1357_v42 = vpop.f32.mrf.mxu3  ;;  %v1506_v63 = vsel %vm1023_vm9, %v1493_v41, -inf }
 0x5a6   : > { %v1383_v44 = vsel %vm986_vm8, %v1357_v42, 0.0  ;;  %v1340_v45 = vpop.f32.mrf.mxu2  ;;  %v1421_v46 = vpop.f32.mrf.mxu1 }
 0x5a7   : > { %v1384_v47 = vadd.f32 %v1383_v44, %v1382_v40  ;;  %v1497_v50 = vsel %vm1023_vm9, %v1421_v46, -inf }
 0x5a8   : > { %1498 = vmax.xlane.f32.xlu2 %v1497_v50 }
 0x5a9   : > { %v1386_v53 = vadd.f32 %v1385_v57, %v1384_v47 }
 0x5ab   : > { %v1759_v26 = vadd.f32 %v3396_v25, %v1386_v53 }
 0x5ac   : > { %v1495_v54 = vpop.f32.mrf.mxu0 }
 0x5ad   : > { %v1359_v55 = vpop.f32.mrf.mxu3  ;;  %v3400_v27 = vadd.f32 %v1759_v26, %v3211_v51 }
 0x5ae   : > { %v1423_v56 = vpop.f32.mrf.mxu1  ;;  %v1445_v58 = vpop.f32.mrf.mxu2 }
 0x5af   : > { %v1500_v49 = vsel %vm1023_vm9, %v1445_v58, -inf }
 0x5b0   : > { %1501 = vmax.xlane.f32.xlu1 %v1500_v49 }
 0x5b5   : > { %v1469_v61 = vpop.f32.mrf.mxu3 }
 0x5b6   : > { %v1447_v48 = vpop.f32.mrf.mxu2  ;;  %v1503_v62 = vsel %vm1023_vm9, %v1469_v61, -inf }
 0x5b7   : > { %1504 = vmax.xlane.f32.xlu0 %v1503_v62 }
 0x5b8   : > { %1507 = vmax.xlane.f32.xlu1 %v1506_v63 }
 0x5bd   : > { %v1471_v43 = vpop.f32.mrf.mxu3 }
 0x5c0   : > { %1618 = vrot.lane.b32.xlu2 %v3315_v0, %s2897_s22 }
 0x61b   : > { %v1499_v1 = vpop.xlane.xlu2 %1498 }
 0x61c   : > { %v1509_v2 = vsub.f32 %v1421_v46, %v1499_v1 }
 0x61e   : > { %v1513_v3 = vmul.f32 1.442695, %v1509_v2 }
 0x620   : > { %2601 = vpow2.f32 %v1513_v3 }
 0x623   : > { %v1502_v4 = vpop.xlane.xlu1 %1501  ;;  %v1619_v29 = vpop.permute.xlu2 %1618 }
 0x624   : > { %v1624_v7 = vsel %vm1220_vm10, %v1619_v29, 0  ;;  %v1510_v17 = vsub.f32 %v1445_v58, %v1502_v4 }
 0x625   : > { %1633 = vmatpush.bf16.msra.mxu2 %v1624_v7 }
 0x626   : > { %v3368_v8 = vpop.eup %2601  ;;  %v1515_v19 = vmul.f32 1.442695, %v1510_v17 }
 0x627   : > { %v1521_v10 = vsel %vm1023_vm9, %v3368_v8, 0.0 }
 0x628   : > { %1522 = vadd.xlane.f32.xlu1 %v1521_v10 }
 0x629   : > { %1711 = vmatpush.bf16.msrb.mxu2 %v3342_v13 }
 0x62a   : > { %v1505_v12 = vpop.xlane.xlu0 %1504 }
 0x62b   : > { %v1511_v14 = vsub.f32 %v1469_v61, %v1505_v12  ;;  %v1508_v0 = vpop.xlane.xlu1 %1507 }
 0x62c   : > { %v1512_v15 = vsub.f32 %v1493_v41, %v1508_v0 }
 0x62d   : > { %v1517_v16 = vmul.f32 1.442695, %v1511_v14 }
 0x62e   : > { %v1519_v18 = vmul.f32 1.442695, %v1512_v15 }
 0x62f   : > { %2603 = vpow2.f32 %v1517_v16 }
 0x630   : > { %2605 = vpow2.f32 %v1519_v18 }
 0x631   : > { %2607 = vpow2.f32 %v1515_v19 }
 0x635   : > { %v3373_v20 = vpop.eup %2603 }
 0x636   : > { %v3375_v21 = vpop.eup %2605  ;;  %v1527_v13 = vsel %vm1023_vm9, %v3373_v20, 0.0 }
 0x637   : > { %1528 = vadd.xlane.f32.xlu2 %v1527_v13  ;;  %v1530_v22 = vsel %vm1023_vm9, %v3375_v21, 0.0  ;;  %v3381_v23 = vpop.eup %2607 }
 0x638   : > { %1531 = vadd.xlane.f32.xlu0 %v1530_v22  ;;  %v1524_v24 = vsel %vm1023_vm9, %v3381_v23, 0.0 }
 0x640   : > { %1525 = vadd.xlane.f32.xlu0 %v1524_v24 }
 0x641   : > { %1639 = vrot.lane.b32.xlu1 %v3284_v59, %s2897_s22  ;;  %v1763_v59 = vsel %vm986_vm8, %v3400_v27, 0.0 }
 0x64f   : > { %1660 = vrot.lane.b32.xlu2 %v3321_v5, %s2897_s22 }
 0x654   : > { %1597 = vrot.lane.b32.xlu0 %v3323_v6, %s2897_s22  ;;  %s3516_s22 = sld [smem:[#allocation4 + $0x1]] (!%p2438_p7) }
 0x65a   : > { %p2115_p1 = scmp.ne.s32.totalorder (!%p2438_p7), %s3516_s22, 4294967196 }
 0x67e   : > { %1764 = vadd.xlane.f32.xlu0 %v1763_v59 }
 0x69b   : > { %v3404_v28 = vpop.xlane.xlu1 %1522 }
 0x69c   : > { %2609 = vrcp.f32 %v3404_v28  ;;  %vm1538_vm7 = vweird.f32 %v3404_v28  ;;  %v1542_v3 = vand.u32 2147483647, %v3404_v28 }
 0x69e   : > { %vm1543_vm13 = vcmp.eq.f32.partialorder %v1542_v3, 8.507059e+37 }
 0x6a2   : > { %v3407_v5 = vpop.eup %2609 }
 0x6a3   : > { %v1534_v31 = vmul.f32 %v3407_v5, %v3404_v28  ;;  %vm1539_vm1 = vweird.f32 %v3407_v5 }
 0x6a4   : > { %vm3423_vm11 = vmor %vm1538_vm7, %vm1539_vm1 }
 0x6a5   : > { %v1535_v51 = vsub.f32 1.0, %v1534_v31 }
 0x6a7   : > { %v1536_v41 = vmul.f32 %v3407_v5, %v1535_v51 }
 0x6aa   : > { %v1529_v6 = vpop.xlane.xlu2 %1528 }
 0x6ab   : > { %2611 = vrcp.f32 %v1529_v6  ;;  %v1532_v30 = vpop.xlane.xlu0 %1531  ;;  %v1574_v42 = vand.u32 2147483648, %v1529_v6  ;;  %v1572_v47 = vand.u32 2147483647, %v1529_v6  ;;  %vm1568_vm0 = vweird.f32 %v1529_v6 }
 0x6ac   : > { %2613 = vrcp.f32 %v1532_v30  ;;  %v1589_v50 = vand.u32 2147483648, %v1532_v30  ;;  %v1587_v53 = vand.u32 2147483647, %v1532_v30  ;;  %vm1583_vm3 = vweird.f32 %v1532_v30 }
 0x6ad   : > { %v1575_v55 = vor.u32 1.1754944e-38, %v1574_v42  ;;  %vm1573_vm4 = vcmp.eq.f32.partialorder %v1572_v47, 8.507059e+37 }
 0x6ae   : > { %v1590_v61 = vor.u32 1.1754944e-38, %v1589_v50  ;;  %vm1588_vm6 = vcmp.eq.f32.partialorder %v1587_v53, 8.507059e+37 }
 0x6b1   : > { %v2612_v32 = vpop.eup %2611 }
 0x6b2   : > { %v2614_v33 = vpop.eup %2613  ;;  %v1564_v34 = vmul.f32 %v2612_v32, %v1529_v6  ;;  %v1661_v35 = vpop.permute.xlu2 %1660  ;;  %vm1569_vm14 = vweird.f32 %v2612_v32 }
 0x6b3   : > { %v1579_v36 = vmul.f32 %v2614_v33, %v1532_v30  ;;  %v1666_v37 = vsel %vm1220_vm10, %v1661_v35, 0  ;;  %v1526_v38 = vpop.xlane.xlu0 %1525  ;;  %v1640_v39 = vpop.permute.xlu1 %1639  ;;  %vm1584_vm15 = vweird.f32 %v2614_v33  ;;  %vm1570_vm2 = vmor %vm1568_vm0, %vm1569_vm14 }
 0x6b4   : > { %v1565_v40 = vsub.f32 1.0, %v1564_v34  ;;  %2615 = vrcp.f32 %v1526_v38  ;;  %1675 = vmatpush.bf16.msrb.mxu0 %v1666_v37  ;;  %v1645_v45 = vsel %vm1220_vm10, %v1640_v39, 0  ;;  %vm1585_vm5 = vmor %vm1583_vm3, %vm1584_vm15  ;;  %v1559_v10 = vand.u32 2147483648, %v1526_v38 }
 0x6b5   : > { %v1580_v44 = vsub.f32 1.0, %v1579_v36  ;;  %1654 = vmatpush.bf16.msra.mxu3 %v1645_v45  ;;  %v1557_v0 = vand.u32 2147483647, %v1526_v38  ;;  %vm1553_vm14 = vweird.f32 %v1526_v38 }
 0x6b6   : > { %v1566_v46 = vmul.f32 %v2612_v32, %v1565_v40  ;;  %v1560_v19 = vor.u32 1.1754944e-38, %v1559_v10 }
 0x6b7   : > { %v1581_v57 = vmul.f32 %v2614_v33, %v1580_v44  ;;  %vm1558_vm0 = vcmp.eq.f32.partialorder %v1557_v0, 8.507059e+37 }
 0x6b8   : > { %1743 = vmatpush.bf16.msra.mxu0 %v3337_v11  ;;  %v1567_v54 = vadd.f32 %v2612_v32, %v1566_v46  ;;  %v1537_v11 = vadd.f32 %v3407_v5, %v1536_v41 }
 0x6b9   : > { %1727 = vmatpush.bf16.msrb.mxu3 %v3310_v60  ;;  %v1582_v56 = vadd.f32 %v2614_v33, %v1581_v57  ;;  %v1544_v60 = vand.u32 2147483648, %v3404_v28 }
 0x6ba   : > { %v2616_v58 = vpop.eup %2615  ;;  %v1571_v49 = vsel %vm1570_vm2, %v2612_v32, %v1567_v54  ;;  %v1541_v7 = vsel %vm3423_vm11, %v3407_v5, %v1537_v11  ;;  %v2898_v5 = vmov 32.0  }
 0x6bb   : > { %v1576_v48 = vsel %vm1573_vm4, %v1575_v55, %v1571_v49  ;;  %v1586_v62 = vsel %vm1585_vm5, %v2614_v33, %v1582_v56  ;;  %v1549_v63 = vmul.f32 %v2616_v58, %v1526_v38  ;;  %vm1554_vm12 = vweird.f32 %v2616_v58 }
 0x6bc   : > { %v1577_v43 = vmul.f32 %v3373_v20, %v1576_v48  ;;  %v1591_v1 = vsel %vm1588_vm6, %v1590_v61, %v1586_v62  ;;  %v1545_v16 = vor.u32 1.1754944e-38, %v1544_v60  ;;  %vm1555_vm15 = vmor %vm1553_vm14, %vm1554_vm12  ;;  %2617 = vrcp.f32 %v2898_v5 }
 0x6bd   : > { %v1592_v4 = vmul.f32 %v3375_v21, %v1591_v1  ;;  %v1550_v29 = vsub.f32 1.0, %v1549_v63  ;;  %vm1903_vm6 = vcmask 523264  }
 0x6be   : > { %v1595_v12 = vpack.c.bf16 %v1577_v43, %v1577_v43  ;;  %v1546_v18 = vsel %vm1543_vm13, %v1545_v16, %v1541_v7 }
 0x6bf   : > { %v1551_v14 = vmul.f32 %v2616_v58, %v1550_v29  ;;  %v1596_v15 = vpack.c.bf16 %v1592_v4, %v1592_v4  ;;  %v1547_v13 = vmul.f32 %v3368_v8, %v1546_v18 }
 0x6c0   : > { %2406 = vmatmul.msk.bf16.vlgmr.msra.gmra.mxu3 %vm1023_vm9, %v1595_v12 }
 0x6c1   : > { %v1552_v17 = vadd.f32 %v2616_v58, %v1551_v14  ;;  %2407 = vmatmul.msk.bf16.vlgmr.msrb.gmra.mxu0 %vm1023_vm9, %v1596_v15  ;;  %v1593_v28 = vpack.c.bf16 %v1547_v13, %v1547_v13 }
 0x6c2   : > { %v2618_v6 = vpop.eup %2617 }
 0x6c3   : > { %v1556_v20 = vsel %vm1555_vm15, %v2616_v58, %v1552_v17  ;;  %v1770_v30 = vmul.f32 32.0, %v2618_v6  ;;  %vm1774_vm1 = vweird.f32 %v2618_v6 }
 0x6c4   : > { %v1561_v21 = vsel %vm1558_vm0, %v1560_v19, %v1556_v20 }
 0x6c5   : > { %v1562_v22 = vmul.f32 %v3381_v23, %v1561_v21  ;;  %v1771_v31 = vsub.f32 1.0, %v1770_v30 }
 0x6c6   : > { %v1598_v24 = vpop.permute.xlu0 %1597 }
 0x6c7   : > { %v1603_v26 = vsel %vm1220_vm10, %v1598_v24, 0  ;;  %v1594_v59 = vpack.c.bf16 %v1562_v22, %v1562_v22  ;;  %v1772_v8 = vmul.f32 %v2618_v6, %v1771_v31  ;;  %v2579_v31 = vld [vmem:[%s3634_s2] ss:$0 sm:$0xff] }
 0x6c8   : > { %1612 = vmatpush.bf16.msra.mxu1 %v1603_v26 }
 0x6c9   : > { %2405 = vmatmul.msk.bf16.vlgmr.msra.gmra.mxu2 %vm1023_vm9, %v1594_v59  ;;  %v1773_v32 = vadd.f32 %v2618_v6, %v1772_v8 }
 0x6cb   : > { %2404 = vmatmul.msk.bf16.vlgmr.msra.gmra.mxu1 %vm1023_vm9, %v1593_v28  ;;  %v3440_v23 = vsel %vm1774_vm1, %v2618_v6, %v1773_v32 }
 0x6cc   : > { %1695 = vmatpush.bf16.msrb.mxu1 %v3332_v9 }
 0x6f1   : > { %v1765_v51 = vpop.xlane.xlu0 %1764 }
 0x6f2   : > { %v1776_v33 = vmul.f32 %v3440_v23, %v1765_v51 }
 0x6f4   : > { %v3444_v34 = vsub.f32 %v3400_v27, %v1776_v33  ;;  %v2580_v33 = vld [vmem:[%s3130_s25] ss:$0 sm:$0xff] }
 0x6f6   : > { %v1780_v9 = vmul.f32 %v3444_v34, %v3444_v34 }
 0x6f8   : > { %v1782_v35 = vsel %vm986_vm8, %v1780_v9, 0.0 }
 0x6f9   : > { %1783 = vadd.xlane.f32.xlu2 %v1782_v35 }
 0x73e   : > { %v1677_v36 = vpop.f32.mrf.mxu0 }
 0x73f   : > { %v1684_v37 = vpack.c.bf16 %v1677_v36, %v1677_v36 }
 0x741   : > { %2411 = vmatmul.msk.bf16.vlgmr.msra.gmra.mxu0 %vm1023_vm9, %v1684_v37 }
 0x743   : > { %v1656_v38 = vpop.f32.mrf.mxu3 }
 0x744   : > { %v1683_v39 = vpack.c.bf16 %v1656_v38, %v1656_v38 }
 0x746   : > { %v1679_v40 = vpop.f32.mrf.mxu0  ;;  %2410 = vmatmul.msk.bf16.vlgmr.msrb.gmra.mxu3 %vm1023_vm9, %v1683_v39 }
 0x747   : > { %v2475_v40 = vld [vmem:[%s3186_s15 + $0x18] sm:$0xff] }
 0x748   : > { %v1614_v41 = vpop.f32.mrf.mxu1  ;;  %1911 = vmatpush.bf16.msra.mxu2 %v2475_v40  ;;  %v2584_v40 = vld [vmem:[%s3136_s12] ss:$0 sm:$0xff] }
 0x749   : > { %v1681_v42 = vpack.c.bf16 %v1614_v41, %v1614_v41  ;;  %v2474_v41 = vld [vmem:[%s3186_s15 + $0x10] sm:$0xff] }
 0x74b   : > { %v1658_v44 = vpop.f32.mrf.mxu3  ;;  %2408 = vmatmul.msk.bf16.vlgmr.msrb.gmra.mxu1 %vm1023_vm9, %v1681_v42  ;;  %v2581_v42 = vld [vmem:[%s855_s3] ss:$0 sm:$0xff] }
 0x74c   : > { %v1635_v27 = vpop.f32.mrf.mxu2  ;;  %1912 = vmatpush.bf16.msra.mxu2 %v2474_v41 }
 0x74d   : > { %v1682_v45 = vpack.c.bf16 %v1635_v27, %v1635_v27  ;;  %v2472_v27 = vld [vmem:[%s3186_s15] sm:$0xff] }
 0x74f   : > { %2409 = vmatmul.msk.bf16.vlgmr.msrb.gmra.mxu2 %vm1023_vm9, %v1682_v45 }
 0x750   : > { %v1616_v46 = vpop.f32.mrf.mxu1 }
 0x754   : > { %v1637_v47 = vpop.f32.mrf.mxu2 }
 0x76c   : > { %v1784_v14 = vpop.xlane.xlu2 %1783 }
 0x76d   : > { %v1788_v0 = vmul.f32 %v1784_v14, %v3440_v23 }
 0x76f   : > { %v1790_v15 = vadd.f32 1e-12, %v1788_v0 }
 0x771   : > { %2619 = vrsqrt.f32 %v1790_v15  ;;  %vm1798_vm10 = vweird.f32 %v1790_v15 }
 0x777   : > { %v2620_v16 = vpop.eup %2619 }
 0x778   : > { %v1793_v17 = vmul.f32 %v2620_v16, %v1790_v15  ;;  %vm1799_vm9 = vweird.f32 %v2620_v16 }
 0x779   : > { %vm1800_vm2 = vmor %vm1798_vm10, %vm1799_vm9 }
 0x77a   : > { %v1794_v18 = vmul.f32 %v2620_v16, %v1793_v17 }
 0x77c   : > { %v1795_v13 = vmul.f32 0.5, %v1794_v18 }
 0x77e   : > { %v1796_v22 = vsub.f32 1.5, %v1795_v13 }
 0x780   : > { %v1797_v26 = vmul.f32 %v2620_v16, %v1796_v22 }
 0x782   : > { %v1801_v5 = vsel %vm1800_vm2, %v2620_v16, %v1797_v26 }
 0x783   : > { %v1812_v8 = vmul.f32 %v1801_v5, %v3444_v34  ;;  %v2473_v34 = vld [vmem:[%s3186_s15 + $0x8] sm:$0xff] }
 0x784   : > { %1913 = vmatpush.bf16.msra.mxu2 %v2473_v34 }
 0x785   : > { %v1817_v9 = vmul.f32 %v2579_v31, %v1812_v8 }
 0x787   : > { %v1822_v37 = vadd.f32 %v2580_v33, %v1817_v9 }
 0x788   : > { %1914 = vmatpush.bf16.msra.mxu2 %v2472_v27 }
 0x7be   : > { %v1745_v50 = vpop.f32.mrf.mxu0 }
 0x7bf   : > { %v1754_v63 = vsel %vm986_vm8, %v1745_v50, 0.0 }
 0x7c6   : > { %v1747_v57 = vpop.f32.mrf.mxu0 }
 0x7c8   : > { %v1697_v53 = vpop.f32.mrf.mxu1 }
 0x7c9   : > { %v1729_v54 = vpop.f32.mrf.mxu3  ;;  %v1749_v11 = vsel %vm986_vm8, %v1697_v53, 0.0 }
 0x7ca   : > { %v1752_v48 = vsel %vm986_vm8, %v1729_v54, 0.0 }
 0x7d0   : > { %v1699_v55 = vpop.f32.mrf.mxu1 }
 0x7d1   : > { %v1731_v56 = vpop.f32.mrf.mxu3 }
 0x7d2   : > { %v1713_v58 = vpop.f32.mrf.mxu2 }
 0x7d3   : > { %v1750_v49 = vsel %vm986_vm8, %v1713_v58, 0.0 }
 0x7d4   : > { %v1751_v61 = vadd.f32 %v1750_v49, %v1749_v11 }
 0x7d6   : > { %v1753_v62 = vadd.f32 %v1752_v48, %v1751_v61 }
 0x7d8   : > { %v1755_v60 = vadd.f32 %v1754_v63, %v1753_v62 }
 0x7da   : > { %v1715_v43 = vpop.f32.mrf.mxu2  ;;  %v1760_v1 = vadd.f32 %v3396_v25, %v1755_v60  ;;  %v2471_v25 = vld [vmem:[%s3172_s26 + $0x8] sm:$0xff] }
 0x7db   : > { %1849 = vmatpush.bf16.msra.mxu1 %v2471_v25 }
 0x7dc   : > { %v1762_v2 = vadd.f32 %v1760_v1, %v3213_v52  ;;  %v2470_v52 = vld [vmem:[%s3172_s26] sm:$0xff]  ;;  %s3638_s26 = sld [smem:[#allocation38_spill]] (!%p2438_p7) }
 0x7de   : > { %v1766_v3 = vsel %vm986_vm8, %v1762_v2, 0.0 }
 0x7df   : > { %1767 = vadd.xlane.f32.xlu1 %v1766_v3  ;;  %1850 = vmatpush.bf16.msra.mxu1 %v2470_v52 }
 0x852   : > { %v1768_v4 = vpop.xlane.xlu1 %1767 }
 0x853   : > { %v1777_v29 = vmul.f32 %v3440_v23, %v1768_v4 }
 0x855   : > { %v1779_v7 = vsub.f32 %v1762_v2, %v1777_v29  ;;  %v2582_v29 = vld [vmem:[%s863_s6] ss:$0 sm:$0xff] }
 0x857   : > { %v1781_v10 = vmul.f32 %v1779_v7, %v1779_v7 }
 0x859   : > { %v1785_v12 = vsel %vm986_vm8, %v1781_v10, 0.0 }
 0x85a   : > { %1786 = vadd.xlane.f32.xlu0 %v1785_v12 }
 0x8cd   : > { %v1787_v19 = vpop.xlane.xlu0 %1786 }
 0x8ce   : > { %v1789_v20 = vmul.f32 %v1787_v19, %v3440_v23 }
 0x8d0   : > { %v1791_v21 = vadd.f32 1e-12, %v1789_v20 }
 0x8d2   : > { %2621 = vrsqrt.f32 %v1791_v21  ;;  %vm1808_vm4 = vweird.f32 %v1791_v21 }
 0x8d8   : > { %v2622_v24 = vpop.eup %2621 }
 0x8d9   : > { %v1803_v59 = vmul.f32 %v2622_v24, %v1791_v21  ;;  %vm1809_vm3 = vweird.f32 %v2622_v24 }
 0x8da   : > { %vm1810_vm5 = vmor %vm1808_vm4, %vm1809_vm3 }
 0x8db   : > { %v1804_v28 = vmul.f32 %v2622_v24, %v1803_v59 }
 0x8dd   : > { %v1805_v6 = vmul.f32 0.5, %v1804_v28 }
 0x8df   : > { %v1806_v30 = vsub.f32 1.5, %v1805_v6 }
 0x8e1   : > { %v1807_v32 = vmul.f32 %v2622_v24, %v1806_v30 }
 0x8e3   : > { %v1811_v51 = vsel %vm1810_vm5, %v2622_v24, %v1807_v32 }
 0x8e4   : > { %v1813_v35 = vmul.f32 %v1811_v51, %v1779_v7 }
 0x8e6   : > { %v1818_v36 = vmul.f32 %v2579_v31, %v1813_v35 }
 0x8e8   : > { %v1823_v38 = vadd.f32 %v2580_v33, %v1818_v36 }
 0x8ea   : > { %v1824_v39 = vpack.c.bf16 %v1823_v38, %v1822_v37 }
 0x8ec   : > { %2420 = vmatmul.msk.bf16.vlgmr.msra.gmra.mxu1 %vm986_vm8, %v1824_v39 }
 0x969   : > { %v1852_v44 = vpop.f32.mrf.mxu1 }
 0x96a   : > { %v1853_v45 = vadd.f32 %v2581_v42, %v1852_v44 }
 0x96c   : > { %v1857_v46 = vmul.f32 %v1853_v45, %v1853_v45 }
 0x96e   : > { %v1859_v47 = vmul.f32 %v1857_v46, %v1853_v45 }
 0x970   : > { %v1861_v50 = vmul.f32 0.044715, %v1859_v47 }
 0x971   : > { %v1854_v57 = vpop.f32.mrf.mxu1 }
 0x972   : > { %v1863_v53 = vadd.f32 %v1861_v50, %v1853_v45  ;;  %v1855_v54 = vadd.f32 %v2581_v42, %v1854_v57 }
 0x974   : > { %v1865_v55 = vmul.f32 0.7978846, %v1863_v53  ;;  %v1858_v56 = vmul.f32 %v1855_v54, %v1855_v54 }
 0x976   : > { %v1860_v58 = vmul.f32 %v1858_v56, %v1855_v54  ;;  %2623 = vtanh.f32 %v1865_v55 }
 0x978   : > { %v1862_v11 = vmul.f32 0.044715, %v1860_v58 }
 0x97a   : > { %v1864_v49 = vadd.f32 %v1862_v11, %v1855_v54 }
 0x97c   : > { %v1866_v61 = vmul.f32 0.7978846, %v1864_v49  ;;  %v2624_v48 = vpop.eup %2623 }
 0x97d   : > { %v1869_v62 = vadd.f32 1.0, %v2624_v48 }
 0x97e   : > { %2625 = vtanh.f32 %v1866_v61 }
 0x97f   : > { %v1871_v60 = vmul.f32 0.5, %v1869_v62 }
 0x981   : > { %v1873_v2 = vmul.f32 %v1871_v60, %v1853_v45 }
 0x984   : > { %v2626_v63 = vpop.eup %2625 }
 0x985   : > { %v1870_v43 = vadd.f32 1.0, %v2626_v63 }
 0x987   : > { %v1872_v1 = vmul.f32 0.5, %v1870_v43 }
 0x989   : > { %v1874_v3 = vmul.f32 %v1872_v1, %v1855_v54 }
 0x98b   : > { %v1875_v4 = vpack.c.bf16 %v1874_v3, %v1873_v2 }
 0x98d   : > { %2437 = vmatmul.msk.bf16.vlgmr.msra.gmra.mxu2 %vm1903_vm6, %v1875_v4 }
 0xa10   : > { %v1916_v7 = vpop.f32.mrf.mxu2 }
 0xa11   : > { %v1917_v10 = vadd.f32 %v2582_v29, %v1916_v7 }
 0xa13   : > { %v1921_v12 = vadd.f32 %v1917_v10, %v1822_v37 }
 0xa15   : > { %v1923_v14 = vsel %vm986_vm8, %v1921_v12, 0.0 }
 0xa16   : > { %1924 = vadd.xlane.f32.xlu1 %v1923_v14 }
 0xa18   : > { %v1918_v0 = vpop.f32.mrf.mxu2 }
 0xa19   : > { %v1919_v15 = vadd.f32 %v2582_v29, %v1918_v0 }
 0xa1b   : > { %v1922_v25 = vadd.f32 %v1919_v15, %v1823_v38  ;;  %v2583_v38 = vld [vmem:[%s866_s21] ss:$0 sm:$0xff]  ;;  %s3636_s21 = sld [smem:[#allocation37_spill]] (!%p2438_p7) }
 0xa1d   : > { %v1926_v16 = vsel %vm986_vm8, %v1922_v25, 0.0 }
 0xa1e   : > { %1927 = vadd.xlane.f32.xlu2 %v1926_v16 }
 0xa89   : > { %v1925_v52 = vpop.xlane.xlu1 %1924 }
 0xa8a   : > { %v1929_v17 = vmul.f32 %v1925_v52, %v3440_v23 }
 0xa8c   : > { %v1931_v18 = vsub.f32 %v1921_v12, %v1929_v17 }
 0xa8e   : > { %v1933_v19 = vmul.f32 %v1931_v18, %v1931_v18 }
 0xa90   : > { %v1935_v20 = vsel %vm986_vm8, %v1933_v19, 0.0 }
 0xa91   : > { %v1928_v21 = vpop.xlane.xlu2 %1927  ;;  %1936 = vadd.xlane.f32.xlu0 %v1935_v20 }
 0xa92   : > { %v1930_v13 = vmul.f32 %v1928_v21, %v3440_v23 }
 0xa94   : > { %v1932_v22 = vsub.f32 %v1922_v25, %v1930_v13 }
 0xa96   : > { %v1934_v24 = vmul.f32 %v1932_v22, %v1932_v22 }
 0xa98   : > { %v1938_v26 = vsel %vm986_vm8, %v1934_v24, 0.0 }
 0xa99   : > { %1939 = vadd.xlane.f32.xlu1 %v1938_v26 }
 0xb04   : > { %v1937_v59 = vpop.xlane.xlu0 %1936 }
 0xb05   : > { %v1941_v28 = vmul.f32 %v1937_v59, %v3440_v23 }
 0xb07   : > { %v1943_v5 = vadd.f32 1e-12, %v1941_v28 }
 0xb09   : > { %2627 = vrsqrt.f32 %v1943_v5  ;;  %vm1951_vm11 = vweird.f32 %v1943_v5 }
 0xb0c   : > { %v1940_v6 = vpop.xlane.xlu1 %1939 }
 0xb0d   : > { %v1942_v30 = vmul.f32 %v1940_v6, %v3440_v23 }
 0xb0f   : > { %v2628_v31 = vpop.eup %2627  ;;  %v1944_v8 = vadd.f32 1e-12, %v1942_v30 }
 0xb10   : > { %v1946_v32 = vmul.f32 %v2628_v31, %v1943_v5  ;;  %vm1952_vm7 = vweird.f32 %v2628_v31 }
 0xb11   : > { %2629 = vrsqrt.f32 %v1944_v8  ;;  %vm1953_vm12 = vmor %vm1951_vm11, %vm1952_vm7  ;;  %vm1961_vm14 = vweird.f32 %v1944_v8 }
 0xb12   : > { %v1947_v51 = vmul.f32 %v2628_v31, %v1946_v32 }
 0xb14   : > { %v1948_v33 = vmul.f32 0.5, %v1947_v51 }
 0xb16   : > { %v1949_v9 = vsub.f32 1.5, %v1948_v33 }
 0xb17   : > { %v2630_v35 = vpop.eup %2629 }
 0xb18   : > { %v1950_v36 = vmul.f32 %v2628_v31, %v1949_v9  ;;  %v1956_v37 = vmul.f32 %v2630_v35, %v1944_v8  ;;  %vm1962_vm13 = vweird.f32 %v2630_v35 }
 0xb19   : > { %vm1963_vm15 = vmor %vm1961_vm14, %vm1962_vm13 }
 0xb1a   : > { %v1954_v23 = vsel %vm1953_vm12, %v2628_v31, %v1950_v36  ;;  %v1957_v39 = vmul.f32 %v2630_v35, %v1956_v37 }
 0xb1b   : > { %v1965_v41 = vmul.f32 %v1954_v23, %v1931_v18 }
 0xb1c   : > { %v1958_v34 = vmul.f32 0.5, %v1957_v39 }
 0xb1d   : > { %v1970_v42 = vmul.f32 %v2583_v38, %v1965_v41 }
 0xb1e   : > { %v1959_v44 = vsub.f32 1.5, %v1958_v34 }
 0xb1f   : > { %v1975_v27 = vadd.f32 %v2584_v40, %v1970_v42 }
 0xb20   : > { %v1960_v45 = vmul.f32 %v2630_v35, %v1959_v44 }
 0xb21   : > { %1977 = vst.msk [vmem:[#allocation2] sm:$0xff] %vm986_vm8, %v1975_v27 }
 0xb22   : > { %v1964_v46 = vsel %vm1963_vm15, %v2630_v35, %v1960_v45 }
 0xb23   : > { %v1966_v47 = vmul.f32 %v1964_v46, %v1932_v22 }
 0xb25   : > { %v1971_v50 = vmul.f32 %v2583_v38, %v1966_v47  ;;  %1982 = sbr.rel (%p2438_p7) target bundleno = 3404 (0xd4c), region = 120 }
 0xb27   : > { %v1976_v57 = vadd.f32 %v2584_v40, %v1971_v50 }
 0xb29   : > { %1978 = vst.msk [vmem:[#allocation2 + $0x8] sm:$0xff] %vm986_vm8, %v1976_v57 }
 0xb2a   : > { %v2477_v53 = vld [vmem:[#allocation11 + $0x8] sm:$0xff]  ;;  %v1984_v54 = vrot.slane %v1976_v57, 7  ;;  %vm1986_vm0 = vcmask 1040384   ;;  %v2476_v55 = vld [vmem:[#allocation11] sm:$0xff]  ;;  %v2479_v11 = vld [vmem:[%s3636_s21 + $0x8] sm:$0xff]  ;;  %v2065_v1 = vlaneseq  ;;  %v2109_v4 = vstv %s3516_s22 }
 0xb2b   : > { %2018 = vmatpush.bf16.msra.mxu0 %v2477_v53  ;;  %2056 = vmatpush.bf16.msra.mxu1 %v2479_v11  ;;  %v2478_v49 = vld [vmem:[%s3636_s21] sm:$0xff]  ;;  %vm2063_vm1 = vcmask 33792   ;;  %vm2096_vm9 = vcmask 33793   ;;  %v2081_v14 = vstv %s3518_s20  ;;  %vm2068_vm2 = vcmask 32768   ;;  %s2116_s18 = scalar_select %p2115_p1, 1, 0 }
 0xb2c   : > { %v1987_v56 = vsel %vm1986_vm0, %v1975_v27, %v1984_v54  ;;  %v2631_v61 = vld [vmem:[%s3637_s5] ss:$0 sm:$0xff]  ;;  %v2066_v2 = vand.u32 127, %v2065_v1  ;;  %s2088_s2 = scalar_select %p2087_p4, 1, 0  ;;  %vm2141_vm7 = vcmask 0  }
 0xb2d   : > { %v1988_v58 = vpack.c.bf16 %v1987_v56, %v1987_v56  ;;  %v2632_v3 = vld [vmem:[%s3638_s26] ss:$0 sm:$0xff]  ;;  %s2117_s9 = scvt.s32.f32 %s2116_s18 }
 0xb2e   : > { %vm2110_vm10 = vcmp.eq.s32.totalorder %v2066_v2, %v2109_v4  ;;  %s2089_s24 = scvt.s32.f32 %s2088_s2 }
 0xb2f   : > { %2019 = vmatpush.bf16.msra.mxu0 %v2476_v55  ;;  %2057 = vmatpush.bf16.msra.mxu1 %v2478_v49  ;;  %v2119_v28 = vstv %s2117_s9 }
 0xb30   : > { %v2091_v5 = vstv %s2089_s24 }
 0xb31   : > { %v2125_v6 = vadd.f32 %v2119_v28, %v2091_v5 }
 0xb32   : > { %2447 = vmatmul.msk.bf16.vlgmr.msra.gmra.mxu0 %vm986_vm8, %v1988_v58 }
 0xb33   : > { %vm2131_vm3 = vweird.f32 %v2125_v6  ;;  %v2137_v39 = vand.u32 2147483648, %v2125_v6  ;;  %v2135_v41 = vand.u32 2147483647, %v2125_v6 }
 0xb35   : > { %v2138_v45 = vor.u32 1.1754944e-38, %v2137_v39  ;;  %vm2136_vm6 = vcmp.eq.f32.partialorder %v2135_v41, 8.507059e+37 }
 0xbaf   : > { %v2021_v48 = vpop.f32.mrf.mxu0 }
 0xbb0   : > { %v2022_v62 = vadd.f32 %v2631_v61, %v2021_v48 }
 0xbb2   : > { %2633 = vtanh.f32 %v2022_v62 }
 0xbb7   : > { %v2023_v63 = vpop.f32.mrf.mxu0 }
 0xbb8   : > { %v2634_v60 = vpop.eup %2633 }
 0xbb9   : > { %v2026_v43 = vpack.c.bf16 %v2634_v60, %v2634_v60 }
 0xbbb   : > { %2456 = vmatmul.msk.bf16.vlgmr.msra.gmra.mxu1 %vm986_vm8, %v2026_v43  ;;  %vm2082_vm8 = vcmp.eq.s32.totalorder %v2066_v2, %v2081_v14 }
 0xc38   : > { %v2059_v29 = vpop.f32.mrf.mxu1 }
 0xc39   : > { %v2060_v7 = vadd.f32 %v2632_v3, %v2059_v29 }
 0xc3b   : > { %2064 = vst.msk [vmem:[#allocation13] sm:$0x3] %vm2063_vm1, %v2060_v7  ;;  %v2097_v10 = vsel %vm2096_vm9, %v2060_v7, -inf  ;;  %v2111_v12 = vsel %vm2110_vm10, %v2060_v7, 0.0  ;;  %v2083_v25 = vsel %vm2082_vm8, %v2060_v7, 0.0  ;;  %v2069_v16 = vsel %vm2068_vm2, %v2060_v7, -inf }
 0xc3c   : > { %2098 = vmax.xlane.f32.xlu0 %v2097_v10  ;;  %v2112_v0 = vsel %vm2096_vm9, %v2111_v12, 0.0  ;;  %v2084_v52 = vsel %vm2068_vm2, %v2083_v25, 0.0 }
 0xc3d   : > { %2113 = vadd.xlane.f32.xlu2 %v2112_v0 }
 0xc40   : > { %v2061_v15 = vpop.f32.mrf.mxu1 }
 0xc44   : > { %2070 = vmax.xlane.f32.xlu0 %v2069_v16 }
 0xc45   : > { %2085 = vadd.xlane.f32.xlu2 %v2084_v52 }
 0xcaf   : > { %v2099_v17 = vpop.xlane.xlu0 %2098 }
 0xcb0   : > { %v2100_v18 = vsub.f32 %v2060_v7, %v2099_v17  ;;  %v2114_v35 = vpop.xlane.xlu2 %2113 }
 0xcb2   : > { %v2101_v19 = vmul.f32 1.442695, %v2100_v18 }
 0xcb4   : > { %2635 = vpow2.f32 %v2101_v19 }
 0xcb7   : > { %v2071_v20 = vpop.xlane.xlu0 %2070 }
 0xcb8   : > { %v2072_v21 = vsub.f32 %v2060_v7, %v2071_v20  ;;  %v2086_v27 = vpop.xlane.xlu2 %2085 }
 0xcba   : > { %v2636_v13 = vpop.eup %2635  ;;  %v2073_v22 = vmul.f32 1.442695, %v2072_v21 }
 0xcbb   : > { %v2103_v24 = vsel %vm2096_vm9, %v2636_v13, 0.0 }
 0xcbc   : > { %2637 = vpow2.f32 %v2073_v22  ;;  %2104 = vadd.xlane.f32.xlu1 %v2103_v24 }
 0xcbd   : > { %2639 = vrcp.f32 %v2125_v6 }
 0xcc2   : > { %v2638_v26 = vpop.eup %2637 }
 0xcc3   : > { %v2075_v59 = vsel %vm2068_vm2, %v2638_v26, 0.0  ;;  %v2640_v31 = vpop.eup %2639 }
 0xcc4   : > { %2076 = vadd.xlane.f32.xlu1 %v2075_v59  ;;  %v2127_v8 = vmul.f32 %v2640_v31, %v2125_v6  ;;  %vm2132_vm4 = vweird.f32 %v2640_v31 }
 0xcc5   : > { %vm2133_vm5 = vmor %vm2131_vm3, %vm2132_vm4 }
 0xcc6   : > { %v2128_v33 = vsub.f32 1.0, %v2127_v8 }
 0xcc8   : > { %v2129_v37 = vmul.f32 %v2640_v31, %v2128_v33 }
 0xcca   : > { %v2130_v40 = vadd.f32 %v2640_v31, %v2129_v37 }
 0xccc   : > { %v2134_v46 = vsel %vm2133_vm5, %v2640_v31, %v2130_v40 }
 0xccd   : > { %v2139_v53 = vsel %vm2136_vm6, %v2138_v45, %v2134_v46 }
 0xd2f   : > { %v2105_v30 = vpop.xlane.xlu1 %2104 }
 0xd30   : > { %2641 = vlog2.f32 %v2105_v30 }
 0xd36   : > { %v2642_v32 = vpop.eup %2641 }
 0xd37   : > { %v2107_v51 = vmul.f32 0.6931472, %v2642_v32  ;;  %v2077_v9 = vpop.xlane.xlu1 %2076 }
 0xd38   : > { %2643 = vlog2.f32 %v2077_v9 }
 0xd39   : > { %v2108_v36 = vadd.f32 %v2107_v51, %v2099_v17 }
 0xd3b   : > { %v2118_v38 = vsub.f32 %v2108_v36, %v2114_v35 }
 0xd3d   : > { %v2120_v42 = vmul.f32 %v2119_v28, %v2118_v38 }
 0xd3e   : > { %v2644_v23 = vpop.eup %2643 }
 0xd3f   : > { %v2079_v34 = vmul.f32 0.6931472, %v2644_v23  ;;  %v2122_v50 = vrot.slane %v2120_v42, 1 }
 0xd41   : > { %v2080_v44 = vadd.f32 %v2079_v34, %v2071_v20 }
 0xd43   : > { %v2090_v47 = vsub.f32 %v2080_v44, %v2086_v27 }
 0xd45   : > { %v2092_v57 = vmul.f32 %v2091_v5, %v2090_v47 }
 0xd47   : > { %v2124_v54 = vadd.f32 %v2122_v50, %v2092_v57 }
 0xd49   : > { %v2140_v55 = vmul.f32 %v2139_v53, %v2124_v54 }
 0xd4b   : > { %2142 = vst.msk [vmem:[#allocation14] sm:$0x1] %vm2141_vm7, %v2140_v55 }
 0xd4c PF: > { %p2519_p6 = scmp.eq.s32.totalorder %s3060_s4, 1  ;;  %s2899_s15 = smov [#allocation13]  }
 0xd4d   : > { %s2149_s25 = sshll.u32 %s2899_s15, 4  ;;  %s3639_s19 = sld [smem:[#allocation39_spill]]  ;;  %s2150_s25 = int_to_ptr.vmem [resolvable:$true] %s2149_s25 }
 0xd4e   : > { %s3640_s27 = sld [smem:[#allocation40_spill]]  ;;  %s2900_s30 = smov [#allocation14]  }
 0xd4f   : > { %s2161_s5 = sshll.u32 %s2900_s30, 4  ;;  %s2162_s5 = int_to_ptr.vmem [resolvable:$true] %s2161_s5 }
 0xd53   : > { %s2151_s12 = sshll.u32 %s3639_s19, 4  ;;  %s2152_s12 = int_to_ptr.hbm [resolvable:$true] %s2151_s12 }
 0xd54   : > { %2493 = dma.vmem_to_hbm [thread:$0]  (%p2519_p6), %s2150_s25, 32, %s2152_s12, [#allocation7]  }
 0xd55   : > { %s2163_s17 = sshll.u32 %s3640_s27, 4  ;;  %s2164_s17 = int_to_ptr.hbm [resolvable:$true] %s2163_s17 }
 0xd56   : > { %2495 = dma.vmem_to_hbm [thread:$0]  (%p2519_p6), %s2162_s5, 16, %s2164_s17, [#allocation15]  }
 0xd57   : > { %2864 = dma.done.wait (%p2519_p6), [#allocation7], 32  }
 0xd58   : > { %2866 = vsyncadd (%p2519_p6), [#allocation7], 4294967264 }
 0xd59   : > { %2868 = dma.done.wait (%p2519_p6), [#allocation15], 16  }
 0xd5a   : > { %2870 = vsyncadd (%p2519_p6), [#allocation15], 4294967280 }
 0xd5b PF: > { %s3641_s0 = sld [smem:[#allocation22_spill]]  ;;  %s3643_s3 = smov %s2877_s28 }
 0xd5c   : > { %s3642_s22 = sld [smem:[#allocation23_spill]]  ;;  %s3644_s28 = smov %s2881_s29 }
 0xd61   : > { %p44_p8 = scmp.ge.s32.totalorder %s3641_s0, 4  }
 0xd62   : > { %s3645_s29 = smov %s3642_s22 }
 0xd63   :  { %46 = sbr.rel (!%p44_p8) target bundleno = 36 (0x24), region = 199 }
 0xd68   :  { %2182 = vsyncpa [#allocation6], 1 }
 0xd69   :  { %2184 = vsyncpa [#allocation6 + $0x1], 1 }
 0xd6a   :  { %2185 = vsyncpa [#allocation9], 1 }
 0xd6b   :  { %2187 = vsyncpa [#allocation9 + $0x1], 1 }
 0xd6c   :  { %2188 = vsyncpa [#allocation12], 1 }
 0xd6d   :  { %2189 = vsyncpa [#allocation7], 1 }
 0xd6e   :  { %2191 = vsyncpa [#allocation7 + $0x1], 1 }
 0xd6f   :  { %2192 = vsyncpa [#allocation15], 1 }

</bundles_post_ra>
